<compile_context>
chip_gen: v7x
topology: tpu7x:2x2x1
jax: 0.10.0
libtpu: 0.0.40
codegen_flags: <defaults>
</compile_context>

<pallas_src>
import functools
import math

import jax
import jax.numpy as jnp
from jax import lax
from jax.experimental import pallas as pl
from jax.experimental.pallas import tpu as pltpu


# ----------------------------------------------------------------------------
# Fused kernel: QKV projection + quantum attention (online softmax) + measure
# + output projection, one (q-tile, kv-tile) grid step per invocation.
# ----------------------------------------------------------------------------
def _fused_qattn_kernel(
    xq_ref, xkv_ref, wq_ref, bq_ref, wkv_ref, bkv_ref, wo_ref, bo_ref,
    o_ref,
    qn_s, kn_s, v_s, m_s, l_s, acc_s, q_stage_s, kv_stage_s,
    *, num_heads, head_dim, compute_dtype):
    H, hd = num_heads, head_dim
    dim = H * hd
    tm = xq_ref.shape[0]            # q rows (of the (M, dim) view) per tile
    tk = xkv_ref.shape[0]           # kv rows per tile
    j = pl.program_id(1)
    nkv = pl.num_programs(1)
    inv_sqrt_hd = 1.0 / math.sqrt(hd)
    eps = 1e-12

    # ---------------- once per q tile (kv axis is innermost) ----------------
    @pl.when(j == 0)
    def _init():
        # Q projection: (tm, dim) = x_tile @ Wq + bq   (single MXU matmul)
        q_md = jnp.dot(xq_ref[...], wq_ref[...],
                       preferred_element_type=jnp.float32) + bq_ref[...]
        q_stage_s[...] = q_md
        # relayout (tm, H*hd) -> head-major (H*tm, hd) through VMEM
        # (lane-slice loads + full-width stores only; no reshapes).
        for h in range(H):
            qn_s[h * tm:(h + 1) * tm, :] = q_stage_s[:, h * hd:(h + 1) * hd]
        q_hm = qn_s[...]
        # embed(): amplitude encoding; fold the 1/sqrt(hd) score scale in so
        # no extra VPU pass ever touches the (Nq x Nk) score tile.
        qn_s[...] = q_hm * (
            lax.rsqrt(jnp.sum(q_hm * q_hm, axis=-1, keepdims=True) + eps)
            * inv_sqrt_hd)
        # online-softmax state
        m_s[...] = jnp.full_like(m_s, -jnp.inf)
        l_s[...] = jnp.zeros_like(l_s)
        acc_s[...] = jnp.zeros_like(acc_s)

    # ---------------- every (q tile, kv tile) step ----------------
    # Fused K/V projection: (tk, 2*dim) = x_tile @ [Wk | Wv] + [bk | bv].
    kv_md = jnp.dot(xkv_ref[...], wkv_ref[...],
                    preferred_element_type=jnp.float32) + bkv_ref[...]
    kv_stage_s[...] = kv_md
    for h in range(H):                    # head-major relayout via VMEM
        kn_s[h * tk:(h + 1) * tk, :] = kv_stage_s[:, h * hd:(h + 1) * hd]
        v_s[h * tk:(h + 1) * tk, :] = (
            kv_stage_s[:, dim + h * hd:dim + (h + 1) * hd])

    k_hm = kn_s[...]
    kn = k_hm * lax.rsqrt(jnp.sum(k_hm * k_hm, axis=-1, keepdims=True) + eps)

    # Score tile (H*tm, H*tk): MXU inputs in compute_dtype (bf16 on v6e/v7x),
    # f32 accumulation, f32 softmax statistics.
    s = lax.dot_general(
        qn_s[...].astype(compute_dtype), kn.astype(compute_dtype),
        (((1,), (1,)), ((), ())), preferred_element_type=jnp.float32)

    m_prev = m_s[...]
    m_new = jnp.maximum(m_prev, jnp.max(s, axis=-1, keepdims=True))
    alpha = jnp.exp(m_prev - m_new)
    p = jnp.exp(s - m_new)                      # unnormalized softmax weights
    l_s[...] = alpha * l_s[...] + jnp.sum(p, axis=-1, keepdims=True)
    acc_s[...] = alpha * acc_s[...] + jnp.dot(
        p.astype(compute_dtype), v_s[...].astype(compute_dtype),
        preferred_element_type=jnp.float32)
    m_s[...] = m_new

    # ---------------- finalize at the last kv tile ----------------
    @pl.when(j == nkv - 1)
    def _finalize():
        # softmax normalization folded to one per-row reciprocal (EUP slot)
        attended = acc_s[...] * pl.reciprocal(l_s[...], approx=True)
        # measure(): Born rule (elementwise square)
        acc_s[...] = attended * attended
        # fused output projection accumulated per head block -- equivalent to
        # reshaping (H*tm, hd) -> (tm, dim) then @ Wo, but with no relayout.
        out = jnp.zeros((tm, dim), jnp.float32)
        for h in range(H):
            out = out + jnp.dot(acc_s[h * tm:(h + 1) * tm, :],
                                wo_ref[h * hd:(h + 1) * hd, :],
                                preferred_element_type=jnp.float32)
        # single lane-dense (tm, dim) store leaving the kernel
        o_ref[...] = (out + bo_ref[...]).astype(o_ref.dtype)


# ----------------------------------------------------------------------------
# Wrapper / configuration helpers
# ----------------------------------------------------------------------------
def _default_mxu_dtype():
    """bf16 MXU inputs on v6e/v7x (full-rate bf16); f32 on v5e and older."""
    try:
        kind = jax.devices()[0].device_kind.lower()
    except Exception:
        return jnp.float32
    if "v6" in kind or "7" in kind:
        return jnp.bfloat16
    return jnp.float32


def _pick_block(n_rows, requested, max_block):
    """Largest multiple of 8 that divides n_rows, capped at max_block."""
    if requested is not None:
        if n_rows % requested:
            raise ValueError(f"block {requested} must divide {n_rows}")
        return requested
    if n_rows % 8:
        return n_rows                      # tiny / ragged: one full block
    b = min(n_rows, max(8, (max_block // 8) * 8))
    while n_rows % b:
        b -= 8
    return b


def _vmem_limit_bytes(tm, tk, dim, H, hd):
    f32 = 4
    per_step = (tm * dim + tk * dim              # x tiles (q view, kv view)
                + dim * dim + dim                # Wq, bq
                + dim * 2 * dim + 2 * dim        # [Wk|Wv], [bk|bv]
                + dim * dim + dim                # Wo, bo
                + tm * dim)                      # output tile
    scratch = (2 * H * tm * hd + 2 * H * tk * hd + 2 * H * tm
               + tm * dim + tk * 2 * dim)
    scores = (H * tm) * (H * tk)
    est = f32 * (2 * per_step + scratch + 4 * scores) + (8 << 20)
    # floor above the scoped defaults, ceiling below v7x's 64 MiB physical.
    return int(min(max(est, 32 << 20), 56 << 20))


def quantum_inspired_attention(x, params, num_heads=4, *,
                               q_block=None, kv_block=None, mxu_dtype=None):
    """Fused Pallas forward of QuantumInspiredAttention.  x: (B, S, dim)."""
    B, S, dim = x.shape
    if dim % num_heads:
        raise ValueError("dim must be divisible by num_heads")
    H = num_heads
    hd = dim // H
    M = B * S

    if mxu_dtype is None:
        mxu_dtype = _default_mxu_dtype()

    # keep the (H*tile)^2 f32 score tile at a few MiB
    max_block = max(8, min(512, (1024 // H) // 8 * 8))
    tm = _pick_block(M, q_block, max_block)
    tk = _pick_block(M, kv_block, max_block)

    xf = x.reshape(M, dim).astype(jnp.float32)
    wq = params["wq_t"]
    bq = params["bq"].reshape(1, dim)
    wkv = jnp.concatenate([params["wk_t"], params["wv_t"]], axis=1)
    bkv = jnp.concatenate([params["bk"], params["bv"]]).reshape(1, 2 * dim)
    wo = params["wo_t"]
    bo = params["bo"].reshape(1, dim)

    kernel = functools.partial(_fused_qattn_kernel, num_heads=H, head_dim=hd,
                               compute_dtype=mxu_dtype)

    grid_spec = pltpu.PrefetchScalarGridSpec(
        num_scalar_prefetch=0,
        grid=(M // tm, M // tk),
        in_specs=[
            pl.BlockSpec((tm, dim), lambda i, j: (i, 0)),        # x (q view)
            pl.BlockSpec((tk, dim), lambda i, j: (j, 0)),        # x (kv view)
            pl.BlockSpec((dim, dim), lambda i, j: (0, 0)),       # Wq
            pl.BlockSpec((1, dim), lambda i, j: (0, 0)),         # bq
            pl.BlockSpec((dim, 2 * dim), lambda i, j: (0, 0)),   # [Wk|Wv]
            pl.BlockSpec((1, 2 * dim), lambda i, j: (0, 0)),     # [bk|bv]
            pl.BlockSpec((dim, dim), lambda i, j: (0, 0)),       # Wo
            pl.BlockSpec((1, dim), lambda i, j: (0, 0)),         # bo
        ],
        out_specs=pl.BlockSpec((tm, dim), lambda i, j: (i, 0)),
        scratch_shapes=[
            pltpu.VMEM((H * tm, hd), jnp.float32),   # qn (normalized+scaled)
            pltpu.VMEM((H * tk, hd), jnp.float32),   # k head-major staging
            pltpu.VMEM((H * tk, hd), jnp.float32),   # v head-major staging
            pltpu.VMEM((H * tm, 1), jnp.float32),    # m (running max)
            pltpu.VMEM((H * tm, 1), jnp.float32),    # l (running sum)
            pltpu.VMEM((H * tm, hd), jnp.float32),   # acc (running P@V)
            pltpu.VMEM((tm, dim), jnp.float32),      # q projection staging
            pltpu.VMEM((tk, 2 * dim), jnp.float32),  # kv projection staging
        ],
    )

    out = pl.pallas_call(
        kernel,
        grid_spec=grid_spec,
        out_shape=jax.ShapeDtypeStruct((M, dim), jnp.float32),
        compiler_params=pltpu.CompilerParams(
            dimension_semantics=("parallel", "arbitrary"),
            vmem_limit_bytes=_vmem_limit_bytes(tm, tk, dim, H, hd)),
    )(xf, xf, wq, bq, wkv, bkv, wo, bo)

    return out.reshape(B, S, dim)


# ----------------------------------------------------------------------------
# Parameter construction (mimics QuantumInspiredLinear: rank-4 tensor-train
# style weight of shape (out, in) plus bias ~ N(0, 0.02^2)).
# ----------------------------------------------------------------------------
def init_params(key, dim, tt_rank=4):
    def make_linear(k):
        k1, k2, k3 = jax.random.split(k, 3)
        g1 = jax.random.normal(k1, (dim, tt_rank), jnp.float32) * 0.25
        g2 = jax.random.normal(k2, (tt_rank, dim), jnp.float32) * 0.25
        w_pt = g1 @ g2                                   # (out, in), rank 4
        bias = jax.random.normal(k3, (dim,), jnp.float32) * 0.02
        return w_pt.T, bias                              # pre-transposed (in, out)

    kq, kk, kv, ko = jax.random.split(key, 4)
    wq_t, bq = make_linear(kq)
    wk_t, bk = make_linear(kk)
    wv_t, bv = make_linear(kv)
    wo_t, bo = make_linear(ko)
    return dict(wq_t=wq_t, bq=bq, wk_t=wk_t, bk=bk,
                wv_t=wv_t, bv=bv, wo_t=wo_t, bo=bo)


# ----------------------------------------------------------------------------
# Pure-JAX reference mirroring the PyTorch forward (for validation)
# ----------------------------------------------------------------------------
def reference_forward(x, params, num_heads=4):
    B, S, dim = x.shape
    hd = dim // num_heads
    eps = 1e-12
    xf = x.reshape(-1, dim).astype(jnp.float32)
    q = xf @ params["wq_t"] + params["bq"]
    k = xf @ params["wk_t"] + params["bk"]
    v = xf @ params["wv_t"] + params["bv"]
    qf = q.reshape(-1, hd)
    kf = k.reshape(-1, hd)
    vf = v.reshape(-1, hd)
    qn = qf * jax.lax.rsqrt(jnp.sum(qf * qf, -1, keepdims=True) + eps)
    kn = kf * jax.lax.rsqrt(jnp.sum(kf * kf, -1, keepdims=True) + eps)
    att = jax.nn.softmax((qn @ kn.T) * (1.0 / math.sqrt(hd)), axis=-1)
    attended = att @ vf
    measured = attended * attended
    out = measured.reshape(-1, dim) @ params["wo_t"] + params["bo"]
    return out.reshape(B, S, dim)


if __name__ == "__main__":
    B, S, DIM, HEADS = 2, 8, 32, 4          # head_dim = 8 (3 "qubits")

    key = jax.random.PRNGKey(0)
    kx, kp = jax.random.split(key)
    x = jax.random.normal(kx, (B, S, DIM), jnp.float32)
    params = init_params(kp, DIM)

    # small blocks so the (2 x 2) grid exercises the tiled online-softmax path
    y = quantum_inspired_attention(x, params, num_heads=HEADS,
                                   q_block=8, kv_block=8)
    y = jax.block_until_ready(y)
    assert y.shape == (B, S, DIM) and y.dtype == jnp.float32

    y_ref = reference_forward(x, params, num_heads=HEADS)
    # loose tolerance: bf16 MXU inputs (v6e/v7x) + approximate reciprocal
    if not jnp.allclose(y, y_ref, rtol=5e-2, atol=2e-3):
        raise AssertionError(
            f"mismatch vs reference, max abs err {jnp.max(jnp.abs(y - y_ref))}")
    print("KERNEL_OK")
</pallas_src>

<mosaic_0001>
module attributes {stable_mosaic.version = 11 : i64} {
  func.func @_fused_qattn_kernel(%arg0: i32, %arg1: i32, %arg2: memref<8x32xf32, #tpu.memory_space<vmem>>, %arg3: memref<8x32xf32, #tpu.memory_space<vmem>>, %arg4: memref<32x32xf32, #tpu.memory_space<vmem>>, %arg5: memref<1x32xf32, #tpu.memory_space<vmem>>, %arg6: memref<32x64xf32, #tpu.memory_space<vmem>>, %arg7: memref<1x64xf32, #tpu.memory_space<vmem>>, %arg8: memref<32x32xf32, #tpu.memory_space<vmem>>, %arg9: memref<1x32xf32, #tpu.memory_space<vmem>>, %arg10: memref<8x32xf32, #tpu.memory_space<vmem>>, %arg11: memref<32x8xf32, #tpu.memory_space<vmem>>, %arg12: memref<32x8xf32, #tpu.memory_space<vmem>>, %arg13: memref<32x8xf32, #tpu.memory_space<vmem>>, %arg14: memref<32x1xf32, #tpu.memory_space<vmem>>, %arg15: memref<32x1xf32, #tpu.memory_space<vmem>>, %arg16: memref<32x8xf32, #tpu.memory_space<vmem>>, %arg17: memref<8x32xf32, #tpu.memory_space<vmem>>, %arg18: memref<8x64xf32, #tpu.memory_space<vmem>>) attributes {dimension_semantics = [#tpu.dimension_semantics<parallel>, #tpu.dimension_semantics<arbitrary>], iteration_bounds = array<i64: 2, 2>, scalar_prefetch = 0 : i64, scratch_operands = 8 : i64, tpu.core_type = #tpu.core_type<tc>, window_params = [{transform_indices = @transform_0, window_bounds = array<i64: 8, 32>}, {transform_indices = @transform_1, window_bounds = array<i64: 8, 32>}, {pipeline_mode = #tpu.pipeline_mode<synchronous>, transform_indices = @transform_2, window_bounds = array<i64: 32, 32>}, {pipeline_mode = #tpu.pipeline_mode<synchronous>, transform_indices = @transform_3, window_bounds = array<i64: 1, 32>}, {pipeline_mode = #tpu.pipeline_mode<synchronous>, transform_indices = @transform_4, window_bounds = array<i64: 32, 64>}, {pipeline_mode = #tpu.pipeline_mode<synchronous>, transform_indices = @transform_5, window_bounds = array<i64: 1, 64>}, {pipeline_mode = #tpu.pipeline_mode<synchronous>, transform_indices = @transform_6, window_bounds = array<i64: 32, 32>}, {pipeline_mode = #tpu.pipeline_mode<synchronous>, transform_indices = @transform_7, window_bounds = array<i64: 1, 32>}, {transform_indices = @transform_8, window_bounds = array<i64: 8, 32>}]} {
    %c0_i32 = arith.constant 0 : i32
    %0 = arith.cmpi eq, %arg1, %c0_i32 : i32
    %1 = arith.extui %0 : i1 to i32
    %c0_i32_0 = arith.constant 0 : i32
    %2 = arith.cmpi ne, %1, %c0_i32_0 : i32
    scf.if %2 {
      %c0_58 = arith.constant 0 : index
      %c0_59 = arith.constant 0 : index
      %63 = vector.load %arg2[%c0_58, %c0_59] : memref<8x32xf32, #tpu.memory_space<vmem>>, vector<8x32xf32>
      %c0_60 = arith.constant 0 : index
      %c0_61 = arith.constant 0 : index
      %64 = vector.load %arg4[%c0_60, %c0_61] : memref<32x32xf32, #tpu.memory_space<vmem>>, vector<32x32xf32>
      %cst_62 = arith.constant dense<0.000000e+00> : vector<8x32xf32>
      %65 = tpu.matmul %63, %64, %cst_62 {dimension_numbers = #tpu.dot_dimension_numbers<[1], [0], [0], [1], [0, 0, 1, 1], [], []>} : vector<8x32xf32>, vector<32x32xf32>, vector<8x32xf32> -> vector<8x32xf32>
      %c0_63 = arith.constant 0 : index
      %c0_64 = arith.constant 0 : index
      %66 = vector.load %arg5[%c0_63, %c0_64] : memref<1x32xf32, #tpu.memory_space<vmem>>, vector<1x32xf32>
      %67 = vector.broadcast %66 : vector<1x32xf32> to vector<8x32xf32>
      %68 = arith.addf %65, %67 : vector<8x32xf32>
      %c0_65 = arith.constant 0 : index
      %c0_66 = arith.constant 0 : index
      %69 = vector.load %arg17[%c0_65, %c0_66] : memref<8x32xf32, #tpu.memory_space<vmem>>, vector<8x32xf32>
      tpu.vector_store %arg17[%c0_65, %c0_66], %68 {strides = array<i32>} : memref<8x32xf32, #tpu.memory_space<vmem>>, vector<8x32xf32>,
      %c0_67 = arith.constant 0 : index
      %c0_68 = arith.constant 0 : index
      %70 = vector.load %arg17[%c0_67, %c0_68] : memref<8x32xf32, #tpu.memory_space<vmem>>, vector<8x8xf32>
      %c0_69 = arith.constant 0 : index
      %c0_70 = arith.constant 0 : index
      %71 = vector.load %arg11[%c0_69, %c0_70] : memref<32x8xf32, #tpu.memory_space<vmem>>, vector<8x8xf32>
      tpu.vector_store %arg11[%c0_69, %c0_70], %70 {strides = array<i32>} : memref<32x8xf32, #tpu.memory_space<vmem>>, vector<8x8xf32>,
      %c0_71 = arith.constant 0 : index
      %c8_72 = arith.constant 8 : index
      %72 = vector.load %arg17[%c0_71, %c8_72] : memref<8x32xf32, #tpu.memory_space<vmem>>, vector<8x8xf32>
      %c8_73 = arith.constant 8 : index
      %c0_74 = arith.constant 0 : index
      %73 = vector.load %arg11[%c8_73, %c0_74] : memref<32x8xf32, #tpu.memory_space<vmem>>, vector<8x8xf32>
      tpu.vector_store %arg11[%c8_73, %c0_74], %72 {strides = array<i32>} : memref<32x8xf32, #tpu.memory_space<vmem>>, vector<8x8xf32>,
      %c0_75 = arith.constant 0 : index
      %c16_76 = arith.constant 16 : index
      %74 = vector.load %arg17[%c0_75, %c16_76] : memref<8x32xf32, #tpu.memory_space<vmem>>, vector<8x8xf32>
      %c16_77 = arith.constant 16 : index
      %c0_78 = arith.constant 0 : index
      %75 = vector.load %arg11[%c16_77, %c0_78] : memref<32x8xf32, #tpu.memory_space<vmem>>, vector<8x8xf32>
      tpu.vector_store %arg11[%c16_77, %c0_78], %74 {strides = array<i32>} : memref<32x8xf32, #tpu.memory_space<vmem>>, vector<8x8xf32>,
      %c0_79 = arith.constant 0 : index
      %c24_80 = arith.constant 24 : index
      %76 = vector.load %arg17[%c0_79, %c24_80] : memref<8x32xf32, #tpu.memory_space<vmem>>, vector<8x8xf32>
      %c24_81 = arith.constant 24 : index
      %c0_82 = arith.constant 0 : index
      %77 = vector.load %arg11[%c24_81, %c0_82] : memref<32x8xf32, #tpu.memory_space<vmem>>, vector<8x8xf32>
      tpu.vector_store %arg11[%c24_81, %c0_82], %76 {strides = array<i32>} : memref<32x8xf32, #tpu.memory_space<vmem>>, vector<8x8xf32>,
      %c0_83 = arith.constant 0 : index
      %c0_84 = arith.constant 0 : index
      %78 = vector.load %arg11[%c0_83, %c0_84] : memref<32x8xf32, #tpu.memory_space<vmem>>, vector<32x8xf32>
      %79 = arith.mulf %78, %78 : vector<32x8xf32>
      %cst_85 = arith.constant dense<0.000000e+00> : vector<32xf32>
      %80 = vector.multi_reduction <add>, %79, %cst_85 [1] : vector<32x8xf32> to vector<32xf32>
      %81 = vector.shape_cast %80 : vector<32xf32> to vector<32x1xf32>
      %cst_86 = arith.constant 9.99999996E-13 : f32
      %82 = vector.broadcast %cst_86 : f32 to vector<32x1xf32>
      %83 = arith.addf %81, %82 : vector<32x1xf32>
      %84 = math.rsqrt %83 : vector<32x1xf32>
      %cst_87 = arith.constant 0.353553385 : f32
      %85 = vector.broadcast %cst_87 : f32 to vector<32x1xf32>
      %86 = arith.mulf %84, %85 : vector<32x1xf32>
      %87 = vector.broadcast %86 : vector<32x1xf32> to vector<32x8xf32>
      %88 = arith.mulf %78, %87 : vector<32x8xf32>
      %c0_88 = arith.constant 0 : index
      %c0_89 = arith.constant 0 : index
      %89 = vector.load %arg11[%c0_88, %c0_89] : memref<32x8xf32, #tpu.memory_space<vmem>>, vector<32x8xf32>
      tpu.vector_store %arg11[%c0_88, %c0_89], %88 {strides = array<i32>} : memref<32x8xf32, #tpu.memory_space<vmem>>, vector<32x8xf32>,
      %cst_90 = arith.constant 0xFF800000 : f32
      %90 = vector.broadcast %cst_90 : f32 to vector<32x1xf32>
      %c0_91 = arith.constant 0 : index
      %c0_92 = arith.constant 0 : index
      %91 = vector.load %arg14[%c0_91, %c0_92] : memref<32x1xf32, #tpu.memory_space<vmem>>, vector<32x1xf32>
      tpu.vector_store %arg14[%c0_91, %c0_92], %90 {strides = array<i32>} : memref<32x1xf32, #tpu.memory_space<vmem>>, vector<32x1xf32>,
      %cst_93 = arith.constant 0.000000e+00 : f32
      %92 = vector.broadcast %cst_93 : f32 to vector<32x1xf32>
      %c0_94 = arith.constant 0 : index
      %c0_95 = arith.constant 0 : index
      %93 = vector.load %arg15[%c0_94, %c0_95] : memref<32x1xf32, #tpu.memory_space<vmem>>, vector<32x1xf32>
      tpu.vector_store %arg15[%c0_94, %c0_95], %92 {strides = array<i32>} : memref<32x1xf32, #tpu.memory_space<vmem>>, vector<32x1xf32>,
      %cst_96 = arith.constant 0.000000e+00 : f32
      %94 = vector.broadcast %cst_96 : f32 to vector<32x8xf32>
      %c0_97 = arith.constant 0 : index
      %c0_98 = arith.constant 0 : index
      %95 = vector.load %arg16[%c0_97, %c0_98] : memref<32x8xf32, #tpu.memory_space<vmem>>, vector<32x8xf32>
      tpu.vector_store %arg16[%c0_97, %c0_98], %94 {strides = array<i32>} : memref<32x8xf32, #tpu.memory_space<vmem>>, vector<32x8xf32>,
    } else {
    }
    %c0 = arith.constant 0 : index
    %c0_1 = arith.constant 0 : index
    %3 = vector.load %arg3[%c0, %c0_1] : memref<8x32xf32, #tpu.memory_space<vmem>>, vector<8x32xf32>
    %c0_2 = arith.constant 0 : index
    %c0_3 = arith.constant 0 : index
    %4 = vector.load %arg6[%c0_2, %c0_3] : memref<32x64xf32, #tpu.memory_space<vmem>>, vector<32x64xf32>
    %cst = arith.constant dense<0.000000e+00> : vector<8x64xf32>
    %5 = tpu.matmul %3, %4, %cst {dimension_numbers = #tpu.dot_dimension_numbers<[1], [0], [0], [1], [0, 0, 1, 1], [], []>} : vector<8x32xf32>, vector<32x64xf32>, vector<8x64xf32> -> vector<8x64xf32>
    %c0_4 = arith.constant 0 : index
    %c0_5 = arith.constant 0 : index
    %6 = vector.load %arg7[%c0_4, %c0_5] : memref<1x64xf32, #tpu.memory_space<vmem>>, vector<1x64xf32>
    %7 = vector.broadcast %6 : vector<1x64xf32> to vector<8x64xf32>
    %8 = arith.addf %5, %7 : vector<8x64xf32>
    %c0_6 = arith.constant 0 : index
    %c0_7 = arith.constant 0 : index
    %9 = vector.load %arg18[%c0_6, %c0_7] : memref<8x64xf32, #tpu.memory_space<vmem>>, vector<8x64xf32>
    tpu.vector_store %arg18[%c0_6, %c0_7], %8 {strides = array<i32>} : memref<8x64xf32, #tpu.memory_space<vmem>>, vector<8x64xf32>,
    %c0_8 = arith.constant 0 : index
    %c0_9 = arith.constant 0 : index
    %10 = vector.load %arg18[%c0_8, %c0_9] : memref<8x64xf32, #tpu.memory_space<vmem>>, vector<8x8xf32>
    %c0_10 = arith.constant 0 : index
    %c0_11 = arith.constant 0 : index
    %11 = vector.load %arg12[%c0_10, %c0_11] : memref<32x8xf32, #tpu.memory_space<vmem>>, vector<8x8xf32>
    tpu.vector_store %arg12[%c0_10, %c0_11], %10 {strides = array<i32>} : memref<32x8xf32, #tpu.memory_space<vmem>>, vector<8x8xf32>,
    %c0_12 = arith.constant 0 : index
    %c32 = arith.constant 32 : index
    %12 = vector.load %arg18[%c0_12, %c32] : memref<8x64xf32, #tpu.memory_space<vmem>>, vector<8x8xf32>
    %c0_13 = arith.constant 0 : index
    %c0_14 = arith.constant 0 : index
    %13 = vector.load %arg13[%c0_13, %c0_14] : memref<32x8xf32, #tpu.memory_space<vmem>>, vector<8x8xf32>
    tpu.vector_store %arg13[%c0_13, %c0_14], %12 {strides = array<i32>} : memref<32x8xf32, #tpu.memory_space<vmem>>, vector<8x8xf32>,
    %c0_15 = arith.constant 0 : index
    %c8 = arith.constant 8 : index
    %14 = vector.load %arg18[%c0_15, %c8] : memref<8x64xf32, #tpu.memory_space<vmem>>, vector<8x8xf32>
    %c8_16 = arith.constant 8 : index
    %c0_17 = arith.constant 0 : index
    %15 = vector.load %arg12[%c8_16, %c0_17] : memref<32x8xf32, #tpu.memory_space<vmem>>, vector<8x8xf32>
    tpu.vector_store %arg12[%c8_16, %c0_17], %14 {strides = array<i32>} : memref<32x8xf32, #tpu.memory_space<vmem>>, vector<8x8xf32>,
    %c0_18 = arith.constant 0 : index
    %c40 = arith.constant 40 : index
    %16 = vector.load %arg18[%c0_18, %c40] : memref<8x64xf32, #tpu.memory_space<vmem>>, vector<8x8xf32>
    %c8_19 = arith.constant 8 : index
    %c0_20 = arith.constant 0 : index
    %17 = vector.load %arg13[%c8_19, %c0_20] : memref<32x8xf32, #tpu.memory_space<vmem>>, vector<8x8xf32>
    tpu.vector_store %arg13[%c8_19, %c0_20], %16 {strides = array<i32>} : memref<32x8xf32, #tpu.memory_space<vmem>>, vector<8x8xf32>,
    %c0_21 = arith.constant 0 : index
    %c16 = arith.constant 16 : index
    %18 = vector.load %arg18[%c0_21, %c16] : memref<8x64xf32, #tpu.memory_space<vmem>>, vector<8x8xf32>
    %c16_22 = arith.constant 16 : index
    %c0_23 = arith.constant 0 : index
    %19 = vector.load %arg12[%c16_22, %c0_23] : memref<32x8xf32, #tpu.memory_space<vmem>>, vector<8x8xf32>
    tpu.vector_store %arg12[%c16_22, %c0_23], %18 {strides = array<i32>} : memref<32x8xf32, #tpu.memory_space<vmem>>, vector<8x8xf32>,
    %c0_24 = arith.constant 0 : index
    %c48 = arith.constant 48 : index
    %20 = vector.load %arg18[%c0_24, %c48] : memref<8x64xf32, #tpu.memory_space<vmem>>, vector<8x8xf32>
    %c16_25 = arith.constant 16 : index
    %c0_26 = arith.constant 0 : index
    %21 = vector.load %arg13[%c16_25, %c0_26] : memref<32x8xf32, #tpu.memory_space<vmem>>, vector<8x8xf32>
    tpu.vector_store %arg13[%c16_25, %c0_26], %20 {strides = array<i32>} : memref<32x8xf32, #tpu.memory_space<vmem>>, vector<8x8xf32>,
    %c0_27 = arith.constant 0 : index
    %c24 = arith.constant 24 : index
    %22 = vector.load %arg18[%c0_27, %c24] : memref<8x64xf32, #tpu.memory_space<vmem>>, vector<8x8xf32>
    %c24_28 = arith.constant 24 : index
    %c0_29 = arith.constant 0 : index
    %23 = vector.load %arg12[%c24_28, %c0_29] : memref<32x8xf32, #tpu.memory_space<vmem>>, vector<8x8xf32>
    tpu.vector_store %arg12[%c24_28, %c0_29], %22 {strides = array<i32>} : memref<32x8xf32, #tpu.memory_space<vmem>>, vector<8x8xf32>,
    %c0_30 = arith.constant 0 : index
    %c56 = arith.constant 56 : index
    %24 = vector.load %arg18[%c0_30, %c56] : memref<8x64xf32, #tpu.memory_space<vmem>>, vector<8x8xf32>
    %c24_31 = arith.constant 24 : index
    %c0_32 = arith.constant 0 : index
    %25 = vector.load %arg13[%c24_31, %c0_32] : memref<32x8xf32, #tpu.memory_space<vmem>>, vector<8x8xf32>
    tpu.vector_store %arg13[%c24_31, %c0_32], %24 {strides = array<i32>} : memref<32x8xf32, #tpu.memory_space<vmem>>, vector<8x8xf32>,
    %c0_33 = arith.constant 0 : index
    %c0_34 = arith.constant 0 : index
    %26 = vector.load %arg12[%c0_33, %c0_34] : memref<32x8xf32, #tpu.memory_space<vmem>>, vector<32x8xf32>
    %27 = arith.mulf %26, %26 : vector<32x8xf32>
    %cst_35 = arith.constant dense<0.000000e+00> : vector<32xf32>
    %28 = vector.multi_reduction <add>, %27, %cst_35 [1] : vector<32x8xf32> to vector<32xf32>
    %29 = vector.shape_cast %28 : vector<32xf32> to vector<32x1xf32>
    %cst_36 = arith.constant 9.99999996E-13 : f32
    %30 = vector.broadcast %cst_36 : f32 to vector<32x1xf32>
    %31 = arith.addf %29, %30 : vector<32x1xf32>
    %32 = math.rsqrt %31 : vector<32x1xf32>
    %33 = vector.broadcast %32 : vector<32x1xf32> to vector<32x8xf32>
    %34 = arith.mulf %26, %33 : vector<32x8xf32>
    %c0_37 = arith.constant 0 : index
    %c0_38 = arith.constant 0 : index
    %35 = vector.load %arg11[%c0_37, %c0_38] : memref<32x8xf32, #tpu.memory_space<vmem>>, vector<32x8xf32>
    %cst_39 = arith.constant dense<0.000000e+00> : vector<32x32xf32>
    %36 = tpu.matmul %35, %34, %cst_39 {dimension_numbers = #tpu.dot_dimension_numbers<[1], [1], [0], [0], [0, 0, 1, 0], [], []>} : vector<32x8xf32>, vector<32x8xf32>, vector<32x32xf32> -> vector<32x32xf32>
    %c0_40 = arith.constant 0 : index
    %c0_41 = arith.constant 0 : index
    %37 = vector.load %arg14[%c0_40, %c0_41] : memref<32x1xf32, #tpu.memory_space<vmem>>, vector<32x1xf32>
    %cst_42 = arith.constant dense<0xFF800000> : vector<32xf32>
    %38 = vector.multi_reduction <maximumf>, %36, %cst_42 [1] : vector<32x32xf32> to vector<32xf32>
    %39 = vector.shape_cast %38 : vector<32xf32> to vector<32x1xf32>
    %40 = arith.maximumf %37, %39 : vector<32x1xf32>
    %41 = arith.subf %37, %40 : vector<32x1xf32>
    %42 = math.exp %41 : vector<32x1xf32>
    %43 = vector.broadcast %40 : vector<32x1xf32> to vector<32x32xf32>
    %44 = arith.subf %36, %43 : vector<32x32xf32>
    %45 = math.exp %44 : vector<32x32xf32>
    %c0_43 = arith.constant 0 : index
    %c0_44 = arith.constant 0 : index
    %46 = vector.load %arg15[%c0_43, %c0_44] : memref<32x1xf32, #tpu.memory_space<vmem>>, vector<32x1xf32>
    %47 = arith.mulf %42, %46 : vector<32x1xf32>
    %cst_45 = arith.constant dense<0.000000e+00> : vector<32xf32>
    %48 = vector.multi_reduction <add>, %45, %cst_45 [1] : vector<32x32xf32> to vector<32xf32>
    %49 = vector.shape_cast %48 : vector<32xf32> to vector<32x1xf32>
    %50 = arith.addf %47, %49 : vector<32x1xf32>
    %c0_46 = arith.constant 0 : index
    %c0_47 = arith.constant 0 : index
    %51 = vector.load %arg15[%c0_46, %c0_47] : memref<32x1xf32, #tpu.memory_space<vmem>>, vector<32x1xf32>
    tpu.vector_store %arg15[%c0_46, %c0_47], %50 {strides = array<i32>} : memref<32x1xf32, #tpu.memory_space<vmem>>, vector<32x1xf32>,
    %c0_48 = arith.constant 0 : index
    %c0_49 = arith.constant 0 : index
    %52 = vector.load %arg16[%c0_48, %c0_49] : memref<32x8xf32, #tpu.memory_space<vmem>>, vector<32x8xf32>
    %53 = vector.broadcast %42 : vector<32x1xf32> to vector<32x8xf32>
    %54 = arith.mulf %53, %52 : vector<32x8xf32>
    %c0_50 = arith.constant 0 : index
    %c0_51 = arith.constant 0 : index
    %55 = vector.load %arg13[%c0_50, %c0_51] : memref<32x8xf32, #tpu.memory_space<vmem>>, vector<32x8xf32>
    %cst_52 = arith.constant dense<0.000000e+00> : vector<32x8xf32>
    %56 = tpu.matmul %45, %55, %cst_52 {dimension_numbers = #tpu.dot_dimension_numbers<[1], [0], [0], [1], [0, 0, 1, 1], [], []>} : vector<32x32xf32>, vector<32x8xf32>, vector<32x8xf32> -> vector<32x8xf32>
    %57 = arith.addf %54, %56 : vector<32x8xf32>
    %c0_53 = arith.constant 0 : index
    %c0_54 = arith.constant 0 : index
    %58 = vector.load %arg16[%c0_53, %c0_54] : memref<32x8xf32, #tpu.memory_space<vmem>>, vector<32x8xf32>
    tpu.vector_store %arg16[%c0_53, %c0_54], %57 {strides = array<i32>} : memref<32x8xf32, #tpu.memory_space<vmem>>, vector<32x8xf32>,
    %c0_55 = arith.constant 0 : index
    %c0_56 = arith.constant 0 : index
    %59 = vector.load %arg14[%c0_55, %c0_56] : memref<32x1xf32, #tpu.memory_space<vmem>>, vector<32x1xf32>
    tpu.vector_store %arg14[%c0_55, %c0_56], %40 {strides = array<i32>} : memref<32x1xf32, #tpu.memory_space<vmem>>, vector<32x1xf32>,
    %c1_i32 = arith.constant 1 : i32
    %60 = arith.cmpi eq, %arg1, %c1_i32 : i32
    %61 = arith.extui %60 : i1 to i32
    %c0_i32_57 = arith.constant 0 : i32
    %62 = arith.cmpi ne, %61, %c0_i32_57 : i32
    scf.if %62 {
      %c0_58 = arith.constant 0 : index
      %c0_59 = arith.constant 0 : index
      %63 = vector.load %arg16[%c0_58, %c0_59] : memref<32x8xf32, #tpu.memory_space<vmem>>, vector<32x8xf32>
      %c0_60 = arith.constant 0 : index
      %c0_61 = arith.constant 0 : index
      %64 = vector.load %arg15[%c0_60, %c0_61] : memref<32x1xf32, #tpu.memory_space<vmem>>, vector<32x1xf32>
      %65 = tpu.reciprocal %64 {approx = true} : vector<32x1xf32> -> vector<32x1xf32>
      %66 = vector.broadcast %65 : vector<32x1xf32> to vector<32x8xf32>
      %67 = arith.mulf %63, %66 : vector<32x8xf32>
      %68 = arith.mulf %67, %67 : vector<32x8xf32>
      %c0_62 = arith.constant 0 : index
      %c0_63 = arith.constant 0 : index
      %69 = vector.load %arg16[%c0_62, %c0_63] : memref<32x8xf32, #tpu.memory_space<vmem>>, vector<32x8xf32>
      tpu.vector_store %arg16[%c0_62, %c0_63], %68 {strides = array<i32>} : memref<32x8xf32, #tpu.memory_space<vmem>>, vector<32x8xf32>,
      %cst_64 = arith.constant 0.000000e+00 : f32
      %70 = vector.broadcast %cst_64 : f32 to vector<8x32xf32>
      %c0_65 = arith.constant 0 : index
      %c0_66 = arith.constant 0 : index
      %71 = vector.load %arg16[%c0_65, %c0_66] : memref<32x8xf32, #tpu.memory_space<vmem>>, vector<8x8xf32>
      %c0_67 = arith.constant 0 : index
      %c0_68 = arith.constant 0 : index
      %72 = vector.load %arg8[%c0_67, %c0_68] : memref<32x32xf32, #tpu.memory_space<vmem>>, vector<8x32xf32>
      %cst_69 = arith.constant dense<0.000000e+00> : vector<8x32xf32>
      %73 = tpu.matmul %71, %72, %cst_69 {dimension_numbers = #tpu.dot_dimension_numbers<[1], [0], [0], [1], [0, 0, 1, 1], [], []>} : vector<8x8xf32>, vector<8x32xf32>, vector<8x32xf32> -> vector<8x32xf32>
      %74 = arith.addf %70, %73 : vector<8x32xf32>
      %c8_70 = arith.constant 8 : index
      %c0_71 = arith.constant 0 : index
      %75 = vector.load %arg16[%c8_70, %c0_71] : memref<32x8xf32, #tpu.memory_space<vmem>>, vector<8x8xf32>
      %c8_72 = arith.constant 8 : index
      %c0_73 = arith.constant 0 : index
      %76 = vector.load %arg8[%c8_72, %c0_73] : memref<32x32xf32, #tpu.memory_space<vmem>>, vector<8x32xf32>
      %cst_74 = arith.constant dense<0.000000e+00> : vector<8x32xf32>
      %77 = tpu.matmul %75, %76, %cst_74 {dimension_numbers = #tpu.dot_dimension_numbers<[1], [0], [0], [1], [0, 0, 1, 1], [], []>} : vector<8x8xf32>, vector<8x32xf32>, vector<8x32xf32> -> vector<8x32xf32>
      %78 = arith.addf %74, %77 : vector<8x32xf32>
      %c16_75 = arith.constant 16 : index
      %c0_76 = arith.constant 0 : index
      %79 = vector.load %arg16[%c16_75, %c0_76] : memref<32x8xf32, #tpu.memory_space<vmem>>, vector<8x8xf32>
      %c16_77 = arith.constant 16 : index
      %c0_78 = arith.constant 0 : index
      %80 = vector.load %arg8[%c16_77, %c0_78] : memref<32x32xf32, #tpu.memory_space<vmem>>, vector<8x32xf32>
      %cst_79 = arith.constant dense<0.000000e+00> : vector<8x32xf32>
      %81 = tpu.matmul %79, %80, %cst_79 {dimension_numbers = #tpu.dot_dimension_numbers<[1], [0], [0], [1], [0, 0, 1, 1], [], []>} : vector<8x8xf32>, vector<8x32xf32>, vector<8x32xf32> -> vector<8x32xf32>
      %82 = arith.addf %78, %81 : vector<8x32xf32>
      %c24_80 = arith.constant 24 : index
      %c0_81 = arith.constant 0 : index
      %83 = vector.load %arg16[%c24_80, %c0_81] : memref<32x8xf32, #tpu.memory_space<vmem>>, vector<8x8xf32>
      %c24_82 = arith.constant 24 : index
      %c0_83 = arith.constant 0 : index
      %84 = vector.load %arg8[%c24_82, %c0_83] : memref<32x32xf32, #tpu.memory_space<vmem>>, vector<8x32xf32>
      %cst_84 = arith.constant dense<0.000000e+00> : vector<8x32xf32>
      %85 = tpu.matmul %83, %84, %cst_84 {dimension_numbers = #tpu.dot_dimension_numbers<[1], [0], [0], [1], [0, 0, 1, 1], [], []>} : vector<8x8xf32>, vector<8x32xf32>, vector<8x32xf32> -> vector<8x32xf32>
      %86 = arith.addf %82, %85 : vector<8x32xf32>
      %c0_85 = arith.constant 0 : index
      %c0_86 = arith.constant 0 : index
      %87 = vector.load %arg9[%c0_85, %c0_86] : memref<1x32xf32, #tpu.memory_space<vmem>>, vector<1x32xf32>
      %88 = vector.broadcast %87 : vector<1x32xf32> to vector<8x32xf32>
      %89 = arith.addf %86, %88 : vector<8x32xf32>
      %c0_87 = arith.constant 0 : index
      %c0_88 = arith.constant 0 : index
      %90 = vector.load %arg10[%c0_87, %c0_88] : memref<8x32xf32, #tpu.memory_space<vmem>>, vector<8x32xf32>
      tpu.vector_store %arg10[%c0_87, %c0_88], %89 {strides = array<i32>} : memref<8x32xf32, #tpu.memory_space<vmem>>, vector<8x32xf32>,
    } else {
    }
    return
  }
  func.func @transform_0(%arg0: i32, %arg1: i32) -> (i32, i32) {
    %c0_i32 = arith.constant 0 : i32
    %c0_i32_0 = arith.constant 0 : i32
    return %arg0, %c0_i32 : i32, i32
  }
  func.func @transform_1(%arg0: i32, %arg1: i32) -> (i32, i32) {
    %c0_i32 = arith.constant 0 : i32
    %c0_i32_0 = arith.constant 0 : i32
    return %arg1, %c0_i32 : i32, i32
  }
  func.func @transform_2(%arg0: i32, %arg1: i32) -> (i32, i32) {
    %c0_i32 = arith.constant 0 : i32
    %c0_i32_0 = arith.constant 0 : i32
    %c0_i32_1 = arith.constant 0 : i32
    return %c0_i32, %c0_i32_0 : i32, i32
  }
  func.func @transform_3(%arg0: i32, %arg1: i32) -> (i32, i32) {
    %c0_i32 = arith.constant 0 : i32
    %c0_i32_0 = arith.constant 0 : i32
    %c0_i32_1 = arith.constant 0 : i32
    return %c0_i32, %c0_i32_0 : i32, i32
  }
  func.func @transform_4(%arg0: i32, %arg1: i32) -> (i32, i32) {
    %c0_i32 = arith.constant 0 : i32
    %c0_i32_0 = arith.constant 0 : i32
    %c0_i32_1 = arith.constant 0 : i32
    return %c0_i32, %c0_i32_0 : i32, i32
  }
  func.func @transform_5(%arg0: i32, %arg1: i32) -> (i32, i32) {
    %c0_i32 = arith.constant 0 : i32
    %c0_i32_0 = arith.constant 0 : i32
    %c0_i32_1 = arith.constant 0 : i32
    return %c0_i32, %c0_i32_0 : i32, i32
  }
  func.func @transform_6(%arg0: i32, %arg1: i32) -> (i32, i32) {
    %c0_i32 = arith.constant 0 : i32
    %c0_i32_0 = arith.constant 0 : i32
    %c0_i32_1 = arith.constant 0 : i32
    return %c0_i32, %c0_i32_0 : i32, i32
  }
  func.func @transform_7(%arg0: i32, %arg1: i32) -> (i32, i32) {
    %c0_i32 = arith.constant 0 : i32
    %c0_i32_0 = arith.constant 0 : i32
    %c0_i32_1 = arith.constant 0 : i32
    return %c0_i32, %c0_i32_0 : i32, i32
  }
  func.func @transform_8(%arg0: i32, %arg1: i32) -> (i32, i32) {
    %c0_i32 = arith.constant 0 : i32
    %c0_i32_0 = arith.constant 0 : i32
    return %arg0, %c0_i32 : i32, i32
  }
}

</mosaic_0001>

<bundles_post_ra>
// kernel: tpu_custom_call.1
= control target key start
LH: loop header
LB: loop body
LE: loop exit
PB: predicated region body
PF: predicated region fallthrough
CT: control target
= control target key end

     0   :  { %s2868_s0 = inlined_call_operand.hbm [shape: f32[16,32], index: 0, kind: input, shape index: {}]   ;;  %s2869_s1 = inlined_call_operand.hbm [shape: f32[16,32], index: 1, kind: input, shape index: {}]   ;;  %s2870_s2 = inlined_call_operand.hbm [shape: f32[32,32], index: 2, kind: input, shape index: {}]   ;;  %s2871_s3 = inlined_call_operand.vmem [shape: f32[1,32], index: 3, kind: input, shape index: {}]   ;;  %s2872_s4 = inlined_call_operand.hbm [shape: f32[32,64], index: 4, kind: input, shape index: {}]   ;;  %s2873_s5 = inlined_call_operand.vmem [shape: f32[1,64], index: 5, kind: input, shape index: {}]   ;;  %s2874_s6 = inlined_call_operand.hbm [shape: f32[32,32], index: 6, kind: input, shape index: {}]   ;;  %s2875_s7 = inlined_call_operand.vmem [shape: f32[1,32], index: 7, kind: input, shape index: {}]   ;;  %s2876_s8 = inlined_call_operand.hbm [shape: f32[16,32], index: 8, kind: output, shape index: {}]  }
   0x1   :  { %2885 = sst [smem:[#allocation28_spill]] %s2868_s0 }
   0x2   :  { %2886 = sst [smem:[#allocation29_spill]] %s2870_s2 }
   0x3   :  { %2887 = sst [smem:[#allocation30_spill]] %s2871_s3 }
   0x4   :  { %2888 = sst [smem:[#allocation31_spill]] %s2872_s4 }
   0x5   :  { %2889 = sst [smem:[#allocation32_spill]] %s2873_s5 }
   0x6   :  { %2890 = sst [smem:[#allocation33_spill]] %s2875_s7 }
   0x7   :  { %2891 = sst [smem:[#allocation34_spill]] %s2876_s8 }
   0x8   :  { %13 = vsyncpa [#allocation11], 0 }
   0x9   :  { %15 = vsyncpa [#allocation11 + $0x1], 0 }
   0xa   :  { %16 = vsyncpa [#allocation14], 0 }
   0xb   :  { %18 = vsyncpa [#allocation14 + $0x1], 0 }
   0xc   :  { %19 = vsyncpa [#allocation17], 0 }
   0xd   :  { %20 = vsyncpa [#allocation12], 0 }
   0xe   :  { %22 = vsyncpa [#allocation12 + $0x1], 0  ;;  %s2335_s27 = smov 0   ;;  %s2337_s28 = smov 0  }
   0xf   :  { %s2339_s29 = smov 0   ;;  %s2341_s30 = smov 0  }
  0x10   :  { %s2343_s9 = smov 0   ;;  %s2345_s10 = smov 0  }
  0x11   :  { %s2347_s11 = smov 0   ;;  %s2349_s12 = smov 0  }
  0x12   :  { %s2351_s13 = smov 0   ;;  %s2353_s14 = smov 0  }
  0x13   :  { %s2355_s15 = smov 0  }
  0x14 LB: > { %2892 = sst [smem:[#allocation25_spill]] %s2243_s11  ;;  %s2391_s16 = sadd.s32 4294967295, %s2259_s15   ;;  %s2259_s15 = sphi %s2355_s15, %s28_s15   ;;  %s2255_s14 = sphi %s2353_s14, %s2937_s14   ;;  %s2251_s13 = sphi %s2351_s13, %s2936_s13   ;;  %s2247_s12 = sphi %s2349_s12, %s2935_s12   ;;  %s2243_s11 = sphi %s2347_s11, %s2934_s11   ;;  %s2239_s10 = sphi %s2345_s10, %s2933_s10   ;;  %s2235_s9 = sphi %s2343_s9, %s2932_s9   ;;  %s2231_s30 = sphi %s2341_s30, %s2931_s30   ;;  %s2227_s29 = sphi %s2339_s29, %s2930_s29   ;;  %s2223_s28 = sphi %s2337_s28, %s2929_s28   ;;  %s2219_s27 = sphi %s2335_s27, %s2928_s27  }
  0x15   : > { %2893 = sst [smem:[#allocation26_spill]] %s2247_s12  ;;  %p1597_p0 = scmp.ge.s32.totalorder %s2259_s15, 1 }
  0x16   : > { %p2879_p1 = scmp.eq.s32.totalorder %s2391_s16, 0  ;;  %p249_p2 = scmp.lt.s32.totalorder %s2259_s15, 5 }
  0x17   : > { %s2261_s18 = smov [#allocation15]   ;;  %s2262_s21 = smov [#allocation16]  }
  0x18   : > { %p2396_p3 = pnand %p1597_p0, %p249_p2  ;;  %s261_s19 = sshll.u32 %s2261_s18, 4  ;;  %s2400_s19 = int_to_ptr.vmem [resolvable:$true] %s261_s19 }
  0x19   : > { %s277_s22 = sshll.u32 %s2262_s21, 4  ;;  %s2263_s23 = smov [#allocation18]   ;;  %s2410_s22 = int_to_ptr.vmem [resolvable:$true] %s277_s22 }
  0x1a   : > { %s2894_s17 = scalar_select %p2396_p3, 1, 0 }
  0x1b   : > { %p1794_p4 = pneg %p2396_p3  ;;  %s2412_s24 = sshll.u32 %s2263_s23, 4  ;;  %s294_s24 = int_to_ptr.vmem [resolvable:$true] %s2412_s24 }
  0x1c   : > { %2895 = sst [smem:[#allocation27_spill]] %s2894_s17 }
  0x1d   : > { %p2406_p5 = pnand %p1794_p4, %p2879_p1  ;;  %s2897_s2 = sld [smem:[#allocation29_spill]] }
  0x1f   : > { %p2422_p7 = pneg %p2406_p5 }
  0x23   : > { %s1981_s18 = scalar_lea.hbm %s2897_s2, 512 }
  0x24   : > { %p1982_p6 = scmp.ne.s32.totalorder %s2897_s2, %s1981_s18  ;;  %p1988_p10 = scmp.lt.u32.totalorder %s1981_s18, %s2897_s2 }
  0x26   : > { %p1984_p8 = pnand %p2422_p7, %p1982_p6 }
  0x28   : > { %p1985_p9 = pneg %p1984_p8 }
  0x2a   : > { %p1990_p11 = pnand %p1988_p10, %p1985_p9 }
  0x2c   : > { %1993 = shalt.err (!%p1990_p11)
}
  0x2d   : > { %s1994_s8 = scalar_lea.vmem %s2400_s19, 512  ;;  %p2002_p2 = scmp.lt.s32.totalorder %s2400_s19, %s2400_s19 }
  0x2e   : > { %p1995_p12 = scmp.ne.s32.totalorder %s2400_s19, %s1994_s8  ;;  %p2003_p4 = scmp.lt.s32.totalorder %s1994_s8, %s1994_s8 }
  0x30   : > { %p1997_p13 = pnand %p1995_p12, %p2422_p7  ;;  %p2004_p6 = por %p2003_p4, %p2002_p2 }
  0x32   : > { %p1998_p0 = pneg %p1997_p13 }
  0x34   : > { %p2005_p8 = pnand %p2004_p6, %p1998_p0 }
  0x36   : > { %2008 = shalt.err (!%p2005_p8)
}
  0x37   : > { %s2264_s12 = smov 128   ;;  %s2265_s25 = smov 8  }
  0x38   : > { %1797 = dma.hbm_to_vmem [thread:$0]  (!%p2406_p5), %s2897_s2, 512, %s2400_s19, [#allocation14], %s2264_s12, %s2264_s12, %s2265_s25  }
  0x39   : > { %s2899_s4 = sld [smem:[#allocation31_spill]] }
  0x3f   : > { %s2009_s8 = scalar_lea.hbm %s2899_s4, 512 }
  0x40   : > { %p2010_p9 = scmp.ne.s32.totalorder %s2899_s4, %s2009_s8  ;;  %p2016_p12 = scmp.lt.u32.totalorder %s2009_s8, %s2899_s4 }
  0x42   : > { %p2012_p10 = pnand %p2010_p9, %p2422_p7 }
  0x44   : > { %p2013_p11 = pneg %p2012_p10 }
  0x46   : > { %p2018_p13 = pnand %p2016_p12, %p2013_p11 }
  0x48   : > { %2021 = shalt.err (!%p2018_p13)
}
  0x49   : > { %s2022_s19 = scalar_lea.vmem %s2410_s22, 512  ;;  %p2030_p6 = scmp.lt.s32.totalorder %s2410_s22, %s2410_s22 }
  0x4a   : > { %p2023_p0 = scmp.ne.s32.totalorder %s2410_s22, %s2022_s19  ;;  %p2031_p8 = scmp.lt.s32.totalorder %s2022_s19, %s2022_s19 }
  0x4c   : > { %p2025_p2 = pnand %p2023_p0, %p2422_p7  ;;  %p2032_p9 = por %p2031_p8, %p2030_p6 }
  0x4e   : > { %p2026_p4 = pneg %p2025_p2 }
  0x50   : > { %p2033_p10 = pnand %p2032_p9, %p2026_p4 }
  0x52   : > { %2036 = shalt.err (!%p2033_p10)
}
  0x53   : > { %1800 = dma.hbm_to_vmem [thread:$0]  (!%p2406_p5), %s2899_s4, 512, %s2410_s22, [#allocation17], %s2264_s12, %s2264_s12, %s2265_s25  }
  0x54   : > { %s2037_s26 = scalar_lea.hbm %s2874_s6, 512 }
  0x55   : > { %p2038_p11 = scmp.ne.s32.totalorder %s2874_s6, %s2037_s26  ;;  %p2044_p0 = scmp.lt.u32.totalorder %s2037_s26, %s2874_s6 }
  0x57   : > { %p2040_p12 = pnand %p2038_p11, %p2422_p7 }
  0x59   : > { %p2041_p13 = pneg %p2040_p12 }
  0x5b   : > { %p2046_p2 = pnand %p2044_p0, %p2041_p13 }
  0x5d   : > { %2049 = shalt.err (!%p2046_p2)
}
  0x5e   : > { %s2050_s19 = scalar_lea.vmem %s294_s24, 512  ;;  %p2058_p9 = scmp.lt.s32.totalorder %s294_s24, %s294_s24 }
  0x5f   : > { %p2051_p4 = scmp.ne.s32.totalorder %s294_s24, %s2050_s19  ;;  %p2059_p10 = scmp.lt.s32.totalorder %s2050_s19, %s2050_s19 }
  0x61   : > { %p2053_p6 = pnand %p2051_p4, %p2422_p7  ;;  %p2060_p1 = por %p2059_p10, %p2058_p9 }
  0x63   : > { %p2054_p8 = pneg %p2053_p6 }
  0x65   : > { %p2061_p3 = pnand %p2060_p1, %p2054_p8 }
  0x67   : > { %2064 = shalt.err (!%p2061_p3)
}
  0x68   : > { %1803 = dma.hbm_to_vmem [thread:$0]  (!%p2406_p5), %s2874_s6, 512, %s294_s24, [#allocation17], %s2264_s12, %s2264_s12, %s2265_s25  }
  0x69   : > { %s1596_s7 = sadd.s32 4294967294, %s2259_s15   ;;  %s40_s20 = sadd.s32 1, %s2255_s14 }
  0x6a   : > { %s47_s5 = sadd.s32 1, %s2239_s10  ;;  %p54_p1 = scmp.ne.s32.totalorder %s2239_s10, %s2235_s9 }
  0x6b   : > { %p2882_p3 = scmp.eq.s32.totalorder %s2259_s15, 0  ;;  %p60_p7 = scmp.ne.s32.totalorder %s2235_s9, %s2231_s30 }
  0x6c   : > { %p236_p11 = scmp.eq.s32.totalorder %s2391_s16, 3  ;;  %p242_p13 = scmp.eq.s32.totalorder %s1596_s7, 3 }
  0x6d   : > { %p56_p12 = por %p2882_p3, %p54_p1  ;;  %p2900_p0 = scmp.eq.s32.totalorder %s2391_s16, 0 }
  0x6e   : > { %p2511_p4 = por %p236_p11, %p54_p1  ;;  %p2515_p5 = por %p242_p13, %p60_p7 }
  0x6f   : > { %p2507_p2 = por %p2900_p0, %p60_p7  ;;  %p2881_p6 = scmp.lt.s32.totalorder %s2259_s15, 4 }
  0x70   : > { %s2902_s17 = scalar_select %p2511_p4, 1, 0 }
  0x71   : > { %s2903_s24 = scalar_select %p2515_p5, 1, 0 }
  0x72   : > { %s310_s12 = sand.u32 1, %s2239_s10   ;;  %s1603_s25 = sshll.u32 %s2255_s14, 7 }
  0x73   : > { %s1602_s26 = sshll.u32 %s310_s12, 3  ;;  %s2904_s0 = sld [smem:[#allocation28_spill]] }
  0x74   : > { %s314_s8 = scalar_lea.vmem [#allocation10], %s1602_s26  ;;  %p2529_p8 = pnand %p2881_p6, %p56_p12 }
  0x75   : > { %s321_s19 = sshll.u32 %s314_s8, 4  ;;  %s311_s3 = scalar_lea.sflag [#allocation11], %s310_s12  ;;  %s2533_s19 = int_to_ptr.vmem [resolvable:$true] %s321_s19 }
  0x76   : > { %p2067_p10 = pneg %p2529_p8 }
  0x79   : > { %s2525_s23 = scalar_lea.hbm %s2904_s0, %s1603_s25  ;;  %s2070_s18 = scalar_lea.hbm %s2904_s0, 256 }
  0x7a   : > { %s2065_s7 = scalar_lea.hbm %s2525_s23, 128  ;;  %p2071_p11 = scmp.lt.u32.totalorder %s2525_s23, %s2904_s0 }
  0x7b   : > { %p2066_p9 = scmp.ne.s32.totalorder %s2525_s23, %s2065_s7  ;;  %p2072_p12 = scmp.lt.u32.totalorder %s2070_s18, %s2065_s7 }
  0x7c   : > { %p2074_p0 = scmp.lt.u32.totalorder %s2065_s7, %s2525_s23 }
  0x7d   : > { %p2068_p1 = pnand %p2067_p10, %p2066_p9  ;;  %p2073_p13 = por %p2072_p12, %p2071_p11 }
  0x7f   : > { %p2069_p7 = pneg %p2068_p1  ;;  %p2075_p6 = por %p2074_p0, %p2073_p13 }
  0x81   : > { %p2076_p3 = pnand %p2075_p6, %p2069_p7 }
  0x83   : > { %2079 = shalt.err (!%p2076_p3)
}
  0x84   : > { %s2080_s12 = scalar_lea.vmem %s2533_s19, 128  ;;  %s2266_s25 = smov [#allocation10]  }
  0x85   : > { %p2081_p9 = scmp.ne.s32.totalorder %s2533_s19, %s2080_s12  ;;  %s2085_s26 = sshll.u32 %s2266_s25, 4  ;;  %s2086_s26 = int_to_ptr.vmem [resolvable:$false] %s2085_s26 }
  0x86   : > { %s2087_s21 = scalar_lea.vmem %s2086_s26, 256  ;;  %p2088_p4 = scmp.lt.s32.totalorder %s2533_s19, %s2086_s26 }
  0x87   : > { %p2083_p1 = pnand %p2081_p9, %p2067_p10  ;;  %p2089_p11 = scmp.lt.s32.totalorder %s2087_s21, %s2080_s12 }
  0x89   : > { %p2084_p5 = pneg %p2083_p1  ;;  %p2090_p12 = por %p2089_p11, %p2088_p4 }
  0x8b   : > { %p2091_p13 = pnand %p2090_p12, %p2084_p5 }
  0x8d   : > { %2094 = shalt.err (!%p2091_p13)
}
  0x8e   : > { %1807 = dma.hbm_to_vmem [thread:$0]  (!%p2529_p8), %s2525_s23, 128, %s2533_s19, %s311_s3  }
  0x8f   : > { %s37_s7 = sadd.s32 1, %s2251_s13  ;;  %s73_s22 = sadd.s32 1, %s2227_s29 }
  0x90   : > { %p38_p3 = scmp.ge.s32.totalorder %s37_s7, 2  ;;  %p80_p4 = scmp.ne.s32.totalorder %s2227_s29, %s2223_s28 }
  0x91   : > { %p86_p5 = scmp.ne.s32.totalorder %s2223_s28, %s2219_s27  ;;  %s328_s18 = sand.u32 1, %s2259_s15  }
  0x92   : > { %s2939_s7 = smov (%p38_p3, %s37_s7), 0  ;;  %s2941_s20 = smov (!%p38_p3, %s40_s20), %s2255_s14 }
  0x93   : > { %s70_s8 = ssub.s32 %s2251_s13, %s2939_s7  ;;  %p2906_p6 = scmp.eq.s32.totalorder %s2259_s15, 0 }
  0x94   : > { %p42_p8 = scmp.ge.s32.totalorder %s2941_s20, 2  ;;  %p71_p7 = scmp.eq.s32.totalorder %s70_s8, 0 }
  0x95   : > { %p2576_p10 = por %p80_p4, %p2906_p6  ;;  %p2908_p0 = scmp.eq.s32.totalorder %s2391_s16, 0 }
  0x96   : > { %s2943_s20 = smov (%p42_p8, %s2941_s20), 0  ;;  %s330_s12 = sand.u32 1, %s2227_s29  }
  0x97   : > { %p2582_p9 = por %p86_p5, %p2908_p0  ;;  %s44_s3 = ssub.s32 %s2255_s14, %s2943_s20 }
  0x98   : > { %s2589_s19 = scalar_select %p71_p7, %s2227_s29, %s73_s22  }
  0x99   : > { %s2909_s27 = scalar_select %p2582_p9, 1, 0 }
  0x9a   : > { %p45_p1 = scmp.eq.s32.totalorder %s44_s3, 0  ;;  %s1604_s25 = sshll.u32 %s330_s12, 3 }
  0x9b   : > { %s1605_s26 = sshll.u32 %s2251_s13, 7  ;;  %s332_s4 = scalar_lea.vmem [#allocation13], %s1604_s25 }
  0x9c   : > { %s2598_s21 = scalar_select %p45_p1, %s2239_s10, %s47_s5  }
  0x9d   : > { %s2603_s2 = scalar_lea.hbm %s2869_s1, %s1605_s26  ;;  %s339_s22 = sshll.u32 %s332_s4, 4  ;;  %s2605_s22 = int_to_ptr.vmem [resolvable:$true] %s339_s22 }
  0x9e   : > { %p2910_p11 = scmp.lt.s32.totalorder %s2259_s15, 4  ;;  %s329_s5 = scalar_lea.sflag [#allocation14], %s328_s18 }
  0x9f   : > { %s2095_s0 = scalar_lea.hbm %s2603_s2, 128  ;;  %s2100_s23 = scalar_lea.hbm %s2869_s1, 256 }
  0xa0   : > { %p2611_p12 = pnand %p2910_p11, %p2576_p10  ;;  %p2096_p13 = scmp.ne.s32.totalorder %s2603_s2, %s2095_s0 }
  0xa1   : > { %p2101_p6 = scmp.lt.u32.totalorder %s2603_s2, %s2869_s1  ;;  %p2102_p10 = scmp.lt.u32.totalorder %s2100_s23, %s2095_s0 }
  0xa2   : > { %p2097_p3 = pneg %p2611_p12  ;;  %p2104_p7 = scmp.lt.u32.totalorder %s2095_s0, %s2603_s2 }
  0xa3   : > { %p2103_p8 = por %p2102_p10, %p2101_p6 }
  0xa4   : > { %p2098_p4 = pnand %p2097_p3, %p2096_p13 }
  0xa5   : > { %p2105_p0 = por %p2104_p7, %p2103_p8 }
  0xa6   : > { %p2099_p5 = pneg %p2098_p4 }
  0xa8   : > { %p2106_p1 = pnand %p2105_p0, %p2099_p5 }
  0xaa   : > { %2109 = shalt.err (!%p2106_p1)
}
  0xab   : > { %s2110_s18 = scalar_lea.vmem %s2605_s22, 128  ;;  %s2267_s8 = smov [#allocation13]  }
  0xac   : > { %p2111_p11 = scmp.ne.s32.totalorder %s2605_s22, %s2110_s18  ;;  %s2115_s4 = sshll.u32 %s2267_s8, 4  ;;  %s2116_s4 = int_to_ptr.vmem [resolvable:$false] %s2115_s4 }
  0xad   : > { %s2117_s12 = scalar_lea.vmem %s2116_s4, 256  ;;  %p2118_p9 = scmp.lt.s32.totalorder %s2605_s22, %s2116_s4 }
  0xae   : > { %p2113_p13 = pnand %p2111_p11, %p2097_p3  ;;  %p2119_p6 = scmp.lt.s32.totalorder %s2117_s12, %s2110_s18 }
  0xb0   : > { %p2114_p4 = pneg %p2113_p13  ;;  %p2120_p10 = por %p2119_p6, %p2118_p9 }
  0xb2   : > { %p2121_p8 = pnand %p2120_p10, %p2114_p4 }
  0xb4   : > { %2124 = shalt.err (!%p2121_p8)
}
  0xb5   : > { %1810 = dma.hbm_to_vmem [thread:$0]  (!%p2611_p12), %s2603_s2, 128, %s2605_s22, %s329_s5  }
  0xb6   : > { %s2912_s0 = sld [smem:[#allocation27_spill]] }
  0xbc   : > { %p2913_p5 = scmp.ne.s32.totalorder %s2912_s0, 0 }
  0xbd   : > { %s2643_s23 = sand.u32 (!%p2913_p5), 1, %s2235_s9  }
  0xbe   : > { %348 = sbr.rel (%p2913_p5) target bundleno = 2345 (0x929), region = 52  ;;  %s1607_s25 = sshll.u32 (!%p2913_p5), %s2643_s23, 3 }
  0xbf   : > { %s351_s26 = scalar_lea.sflag (!%p2913_p5), [#allocation11], %s2643_s23  ;;  %s2647_s18 = scalar_lea.vmem (!%p2913_p5), [#allocation10], %s1607_s25 }
  0xc5   : > { %2198 = dma.done.wait (%p2507_p2), %s351_s26, 128  }
  0xc6   : > { %2200 = vsyncadd (%p2507_p2), %s351_s26, 4294967168  ;;  %s359_s2 = sand.u32 1, %s2391_s16   ;;  %s361_s22 = sand.u32 1, %s2223_s28  }
  0xc7   : > { %s2655_s3 = sshll.u32 %s361_s22, 3  ;;  %s360_s5 = scalar_lea.sflag [#allocation14], %s359_s2 }
  0xc8   : > { %s363_s8 = scalar_lea.vmem [#allocation13], %s2655_s3  ;;  %p2914_p9 = scmp.ne.s32.totalorder %s2909_s27, 0 }
  0xca   : > { %2202 = dma.done.wait (%p2914_p9), %s360_s5, 128  }
  0xcb   : > { %2204 = vsyncadd (%p2914_p9), %s360_s5, 4294967168  ;;  %p2915_p12 = scmp.eq.s32.totalorder %s2391_s16, 0 }
  0xcd   : > { %2206 = dma.done.wait (%p2915_p12), [#allocation14], 512   ;;  %p2916_p2 = pmov %p2915_p12 }
  0xcf   : > { %2208 = vsyncadd (%p2916_p2), [#allocation14], 4294966784  ;;  %p2917_p3 = pmov %p2916_p2 }
  0xd0   : > { %p2918_p7 = pmov %p2916_p2 }
  0xd1   : > { %2210 = dma.done.wait (%p2917_p3), [#allocation17], 1024  }
  0xd2   : > { %2212 = vsyncadd (%p2918_p7), [#allocation17], 4294966272  ;;  %s2670_s11 = scalar_lea.vmem [#allocation19], %s1607_s25  ;;  %s2919_s4 = sld [smem:[#allocation25_spill]] }
  0xd8   : > { %p1613_p0 = scmp.ne.s32.totalorder %s2919_s4, 0 }
  0xd9   : > { %v418_v0 = vld [vmem:[#allocation15] sm:$0xff] (!%p1613_p0)  ;;  %v419_v1 = vld [vmem:[#allocation15 + $0x8] sm:$0xff] (!%p1613_p0)  ;;  %v420_v2 = vld [vmem:[#allocation15 + $0x10] sm:$0xff] (!%p1613_p0)  ;;  %v2268_v3 = vmov (!%p1613_p0), 0.0|0.0   ;;  %vm2269_vm0 = vmmov (!%p1613_p0), 0   ;;  %v2270_v6 = vmov (!%p1613_p0), 0.0  }
  0xda   : > { %416 = sbr.rel (%p1613_p0) target bundleno = 739 (0x2e3), region = 76  ;;  %1744 = vmatprep.subr.bf16.mxu0 (!%p1613_p0), %v2268_v3  ;;  %v1745_v4 = vpack.c.bf16 (!%p1613_p0), %v419_v1, %v418_v0  ;;  %v421_v5 = vld [vmem:[#allocation15 + $0x18] sm:$0xff] (!%p1613_p0)  ;;  %1682 = vmatprep.mubr.msk.f32.mxu0 (!%p1613_p0), %vm2269_vm0, %v2270_v6  ;;  %vm505_vm1 = vcmask (!%p1613_p0), 64512   ;;  %vm565_vm2 = vcmask (!%p1613_p0), 7168   ;;  %v2271_v7 = vmov (!%p1613_p0), -inf   ;;  %v417_v9 = vld [vmem:[%s2647_s18] sm:$0xff] (!%p1613_p0) }
  0xdb   : > { %566 = vst.msk [vmem:[#allocation5] sm:$0xff] (!%p1613_p0), %vm565_vm2, %v2271_v7  ;;  %567 = vst.msk [vmem:[#allocation5 + $0x8] sm:$0xff] (!%p1613_p0), %vm565_vm2, %v2271_v7  ;;  %v1748_v8 = vpack.c.bf16 (!%p1613_p0), %v421_v5, %v420_v2  ;;  %vm429_vm3 = vcmask (!%p1613_p0), 261120   ;;  %s2920_s12 = sld [smem:[#allocation30_spill]] (!%p1613_p0)  ;;  %s2272_s0 = smov (!%p1613_p0), 104  }
  0xdc   : > { %568 = vst.msk [vmem:[#allocation5 + $0x10] sm:$0xff] (!%p1613_p0), %vm565_vm2, %v2271_v7  ;;  %569 = vst.msk [vmem:[#allocation5 + $0x18] sm:$0xff] (!%p1613_p0), %vm565_vm2, %v2271_v7  ;;  %1746 = vmatpush3.bf16.msra.mxu0 (!%p1613_p0), %v1745_v4  ;;  %s2273_s25 = smov (!%p1613_p0), 120   ;;  %s2274_s26 = smov (!%p1613_p0), 112  }
  0xdd   : > { %570 = vst.msk [vmem:[#allocation6] sm:$0xff] (!%p1613_p0), %vm565_vm2, %v2270_v6  ;;  %571 = vst.msk [vmem:[#allocation6 + $0x8] sm:$0xff] (!%p1613_p0), %vm565_vm2, %v2270_v6  ;;  %1747 = vmatprep.subr.bf16.mxu0 (!%p1613_p0), %v2268_v3 }
  0xde   : > { %572 = vst.msk [vmem:[#allocation6 + $0x10] sm:$0xff] (!%p1613_p0), %vm565_vm2, %v2270_v6  ;;  %573 = vst.msk [vmem:[#allocation6 + $0x18] sm:$0xff] (!%p1613_p0), %vm565_vm2, %v2270_v6 }
  0xdf   : > { %574 = vst.msk [vmem:[#allocation7] sm:$0xff] (!%p1613_p0), %vm505_vm1, %v2270_v6  ;;  %575 = vst.msk [vmem:[#allocation7 + $0x8] sm:$0xff] (!%p1613_p0), %vm505_vm1, %v2270_v6 }
  0xe0   : > { %576 = vst.msk [vmem:[#allocation7 + $0x10] sm:$0xff] (!%p1613_p0), %vm505_vm1, %v2270_v6  ;;  %577 = vst.msk [vmem:[#allocation7 + $0x18] sm:$0xff] (!%p1613_p0), %vm505_vm1, %v2270_v6  ;;  %1749 = vmatpush3.bf16.msra.mxu0 (!%p1613_p0), %v1748_v8 }
  0xe1   : > { %v1614_v10 = vld [vmem:[%s2920_s12] ss:$0 sm:$0xff] }
  0xe3   : > { %1683 = vmatmul.mubr.msk.f32.vlgmr.msra.gmra.mrb[0].mxu0 %vm429_vm3, %v417_v9 }
 0x1b6   : > { %v499_v11 = vpop.f32.mrb[0].mxu0 }
 0x1b7   : > { %v500_v12 = vadd.f32 %v1614_v10, %v499_v11  ;;  %v1684_v13 = vpop.f32.mrb[1].mxu0 }
 0x1b9   : > { %503 = vst.msk [vmem:[#allocation8] sm:$0xff] %vm429_vm3, %v500_v12 }
 0x1c0   : > { %v504_v14 = vld [vmem:[#allocation8] sm:$0xff] }
 0x1c1   : > { %506 = vst.msk [vmem:[#allocation2] sm:$0xff] %vm505_vm1, %v504_v14  ;;  %521 = vrot.lane.b32.xlu1 %v504_v14, %s2272_s0  ;;  %509 = vrot.lane.b32.xlu0 %v504_v14, %s2273_s25 }
 0x1c5   : > { %515 = vrot.lane.b32.xlu0 %v504_v14, %s2274_s26 }
 0x1c8   : > { %v525_v15 = vld [vmem:[#allocation2] sm:$0xff] }
 0x1c9   : > { %v529_v16 = vmul.f32 %v525_v15, %v525_v15 }
 0x1cb   : > { %v533_v17 = vsel %vm505_vm1, %v529_v16, 0.0 }
 0x1e5   : > { %534 = vadd.xlane.f32.xlu1 %v533_v17 }
 0x233   : > { %v522_v18 = vpop.permute.xlu1 %521  ;;  %v510_v19 = vpop.permute.xlu0 %509 }
 0x234   : > { %524 = vst.msk [vmem:[#allocation2 + $0x18] sm:$0xff] %vm505_vm1, %v522_v18  ;;  %512 = vst.msk [vmem:[#allocation2 + $0x8] sm:$0xff] %vm505_vm1, %v510_v19 }
 0x237   : > { %v516_v20 = vpop.permute.xlu0 %515 }
 0x238   : > { %518 = vst.msk [vmem:[#allocation2 + $0x10] sm:$0xff] %vm505_vm1, %v516_v20 }
 0x23b   : > { %v526_v21 = vld [vmem:[#allocation2 + $0x8] sm:$0xff]  ;;  %v528_v22 = vld [vmem:[#allocation2 + $0x18] sm:$0xff] }
 0x23c   : > { %v530_v23 = vmul.f32 %v526_v21, %v526_v21  ;;  %v532_v24 = vmul.f32 %v528_v22, %v528_v22 }
 0x23e   : > { %v536_v25 = vsel %vm505_vm1, %v530_v23, 0.0  ;;  %v542_v26 = vsel %vm505_vm1, %v532_v24, 0.0 }
 0x23f   : > { %537 = vadd.xlane.f32.xlu0 %v536_v25  ;;  %543 = vadd.xlane.f32.xlu1 %v542_v26  ;;  %v527_v27 = vld [vmem:[#allocation2 + $0x10] sm:$0xff] }
 0x240   : > { %v531_v28 = vmul.f32 %v527_v27, %v527_v27 }
 0x242   : > { %v539_v29 = vsel %vm505_vm1, %v531_v28, 0.0 }
 0x243   : > { %540 = vadd.xlane.f32.xlu0 %v539_v29 }
 0x272   : > { %v535_v30 = vpop.xlane.xlu1 %534 }
 0x273   : > { %v545_v31 = vadd.f32 1e-12, %v535_v30 }
 0x275   : > { %1937 = vrsqrt.f32 %v545_v31 }
 0x27f   : > { %v1938_v32 = vpop.eup %1937 }
 0x280   : > { %v553_v33 = vmul.f32 0.35355338, %v1938_v32 }
 0x282   : > { %v557_v34 = vmul.f32 %v553_v33, %v525_v15 }
 0x284   : > { %561 = vst.msk [vmem:[#allocation2] sm:$0xff] %vm505_vm1, %v557_v34 }
 0x2cc   : > { %v538_v35 = vpop.xlane.xlu0 %537  ;;  %v544_v36 = vpop.xlane.xlu1 %543 }
 0x2cd   : > { %v546_v37 = vadd.f32 1e-12, %v538_v35  ;;  %v548_v38 = vadd.f32 1e-12, %v544_v36 }
 0x2cf   : > { %1939 = vrsqrt.f32 %v546_v37 }
 0x2d0   : > { %1941 = vrsqrt.f32 %v548_v38  ;;  %v541_v39 = vpop.xlane.xlu0 %540 }
 0x2d1   : > { %v547_v40 = vadd.f32 1e-12, %v541_v39 }
 0x2d3   : > { %1943 = vrsqrt.f32 %v547_v40 }
 0x2d9   : > { %v1940_v41 = vpop.eup %1939 }
 0x2da   : > { %v1942_v42 = vpop.eup %1941  ;;  %v554_v43 = vmul.f32 0.35355338, %v1940_v41 }
 0x2db   : > { %v556_v44 = vmul.f32 0.35355338, %v1942_v42 }
 0x2dc   : > { %v558_v45 = vmul.f32 %v554_v43, %v526_v21 }
 0x2dd   : > { %v1944_v46 = vpop.eup %1943  ;;  %v560_v47 = vmul.f32 %v556_v44, %v528_v22 }
 0x2de   : > { %562 = vst.msk [vmem:[#allocation2 + $0x8] sm:$0xff] %vm505_vm1, %v558_v45  ;;  %v555_v48 = vmul.f32 0.35355338, %v1944_v46 }
 0x2df   : > { %564 = vst.msk [vmem:[#allocation2 + $0x18] sm:$0xff] %vm505_vm1, %v560_v47 }
 0x2e0   : > { %v559_v49 = vmul.f32 %v555_v48, %v527_v27 }
 0x2e2   : > { %563 = vst.msk [vmem:[#allocation2 + $0x10] sm:$0xff] %vm505_vm1, %v559_v49 }
 0x2e3 PF: > { %v579_v50 = vld [vmem:[#allocation16] sm:$0xff]  ;;  %v580_v51 = vld [vmem:[#allocation16 + $0x8] sm:$0xff]  ;;  %v581_v52 = vld [vmem:[#allocation16 + $0x10] sm:$0xff]  ;;  %v2275_v53 = vmov 0.0|0.0   ;;  %vm2276_vm4 = vmmov 0   ;;  %v2277_v56 = vmov 0.0  }
 0x2e4   : > { %1750 = vmatprep.subr.bf16.mxu0 %v2275_v53  ;;  %v1751_v54 = vpack.c.bf16 %v580_v51, %v579_v50  ;;  %v582_v55 = vld [vmem:[#allocation16 + $0x18] sm:$0xff]  ;;  %1693 = vmatprep.mubr.msk.f32.mxu0 %vm2276_vm4, %v2277_v56  ;;  %vm590_vm5 = vcmask 261120   ;;  %s2921_s22 = sld [smem:[#allocation32_spill]]  ;;  %vm664_vm6 = vcmask 523264   ;;  %vm667_vm7 = vcmask 64512   ;;  %s2278_s5 = smov 104  }
 0x2e5   : > { %v1754_v57 = vpack.c.bf16 %v582_v55, %v581_v52  ;;  %v578_v58 = vld [vmem:[%s363_s8] sm:$0xff]  ;;  %s2279_s3 = smov 120   ;;  %s2280_s8 = smov 112   ;;  %vm1757_vm8 = vmpackc.low %vm667_vm7, %vm667_vm7  ;;  %v2281_v45 = vmov 0   ;;  %vm944_vm9 = vcmask 7168   ;;  %v2729_v52 = vld [vmem:[#allocation5 + $0x18] sm:$0xff] }
 0x2e6   : > { %1752 = vmatpush3.bf16.msra.mxu0 %v1751_v54  ;;  %v743_v15 = vld [vmem:[#allocation2] sm:$0xff]  ;;  %v744_v34 = vld [vmem:[#allocation2 + $0x8] sm:$0xff]  ;;  %v746_v36 = vld [vmem:[#allocation2 + $0x18] sm:$0xff]  ;;  %1946 = vset.pattern.permute.xlu1 %v2281_v45  ;;  %s2282_s4 = smov 96   ;;  %s2283_s16 = smov 88  }
 0x2e7   : > { %1753 = vmatprep.subr.bf16.mxu0 %v2275_v53  ;;  %1704 = vmatprep.mubr.msk.f32.mxu1 %vm667_vm7, %v743_v15  ;;  %v857_v46 = vld [vmem:[#allocation5 + $0x8] sm:$0xff]  ;;  %v856_v47 = vld [vmem:[#allocation5] sm:$0xff]  ;;  %v2732_v53 = vld [vmem:[#allocation5 + $0x10] sm:$0xff]  ;;  %s2284_s27 = smov 80   ;;  %s2285_s12 = smov 72  }
 0x2e8   : > { %1945 = vset.pattern.permute.xlu0 %v2281_v45  ;;  %s2922_s0 = sld [smem:[#allocation25_spill]] }
 0x2e9   : > { %v745_v35 = vld [vmem:[#allocation2 + $0x10] sm:$0xff] }
 0x2ea   : > { %1755 = vmatpush3.bf16.msra.mxu0 %v1754_v57  ;;  %v1616_v59 = vld [vmem:[%s2921_s22] ss:$0 sm:$0xff] }
 0x2ed   : > { %1694 = vmatmul.mubr.msk.f32.vlgmr.msra.gmra.mrb[0].mxu0 %vm590_vm5, %v578_v58 }
 0x2ee   : > { %p1630_p1 = scmp.ne.s32.totalorder %s2922_s0, 1 }
 0x2ef   : > { %vm2288_vm10 = vmmov (!%p1630_p1), 0   ;;  %s2923_s18 = sld [smem:[#allocation33_spill]] (!%p1630_p1) }
 0x3c0   : > { %v660_v60 = vpop.f32.mrb[0].mxu0 }
 0x3c1   : > { %v661_v61 = vadd.f32 %v1616_v59, %v660_v60  ;;  %v1695_v62 = vpop.f32.mrb[1].mxu0 }
 0x3c3   : > { %665 = vst.msk [vmem:[#allocation9] sm:$0xff] %vm664_vm6, %v661_v61 }
 0x3ca   : > { %v2699_v63 = vld [vmem:[#allocation9] sm:$0xff] }
 0x3cb   : > { %701 = vrot.lane.b32.xlu1 %v2699_v63, %s2278_s5  ;;  %677 = vrot.lane.b32.xlu0 %v2699_v63, %s2279_s3  ;;  %668 = vst.msk [vmem:[#allocation3] sm:$0xff] %vm667_vm7, %v2699_v63 }
 0x3cf   : > { %689 = vrot.lane.b32.xlu0 %v2699_v63, %s2280_s8 }
 0x3d2   : > { %v711_v0 = vld [vmem:[#allocation3] sm:$0xff] }
 0x3d3   : > { %v715_v1 = vmul.f32 %v711_v0, %v711_v0 }
 0x3d5   : > { %v719_v2 = vsel %vm667_vm7, %v715_v1, 0.0 }
 0x3ef   : > { %720 = vadd.xlane.f32.xlu1 %v719_v2 }
 0x43d   : > { %v702_v3 = vpop.permute.xlu1 %701  ;;  %v678_v4 = vpop.permute.xlu0 %677 }
 0x43e   : > { %704 = vst.msk [vmem:[#allocation3 + $0x18] sm:$0xff] %vm667_vm7, %v702_v3  ;;  %680 = vst.msk [vmem:[#allocation3 + $0x8] sm:$0xff] %vm667_vm7, %v678_v4 }
 0x441   : > { %v690_v5 = vpop.permute.xlu0 %689 }
 0x442   : > { %692 = vst.msk [vmem:[#allocation3 + $0x10] sm:$0xff] %vm667_vm7, %v690_v5 }
 0x445   : > { %v712_v6 = vld [vmem:[#allocation3 + $0x8] sm:$0xff]  ;;  %v714_v7 = vld [vmem:[#allocation3 + $0x18] sm:$0xff] }
 0x446   : > { %v716_v8 = vmul.f32 %v712_v6, %v712_v6  ;;  %v718_v9 = vmul.f32 %v714_v7, %v714_v7 }
 0x448   : > { %v722_v10 = vsel %vm667_vm7, %v716_v8, 0.0  ;;  %v728_v11 = vsel %vm667_vm7, %v718_v9, 0.0 }
 0x449   : > { %723 = vadd.xlane.f32.xlu0 %v722_v10  ;;  %729 = vadd.xlane.f32.xlu1 %v728_v11  ;;  %v713_v12 = vld [vmem:[#allocation3 + $0x10] sm:$0xff] }
 0x44a   : > { %v717_v13 = vmul.f32 %v713_v12, %v713_v12 }
 0x44c   : > { %v725_v14 = vsel %vm667_vm7, %v717_v13, 0.0 }
 0x44d   : > { %726 = vadd.xlane.f32.xlu0 %v725_v14 }
 0x47c   : > { %v721_v16 = vpop.xlane.xlu1 %720 }
 0x47d   : > { %v731_v17 = vadd.f32 1e-12, %v721_v16 }
 0x47f   : > { %1947 = vrsqrt.f32 %v731_v17 }
 0x489   : > { %v1948_v24 = vpop.eup %1947 }
 0x48a   : > { %v739_v26 = vmul.f32 %v1948_v24, %v711_v0 }
 0x4d6   : > { %v724_v18 = vpop.xlane.xlu0 %723  ;;  %v730_v19 = vpop.xlane.xlu1 %729 }
 0x4d7   : > { %v732_v20 = vadd.f32 1e-12, %v724_v18  ;;  %v734_v21 = vadd.f32 1e-12, %v730_v19 }
 0x4d9   : > { %1949 = vrsqrt.f32 %v732_v20 }
 0x4da   : > { %v727_v22 = vpop.xlane.xlu0 %726  ;;  %1951 = vrsqrt.f32 %v734_v21 }
 0x4db   : > { %v733_v23 = vadd.f32 1e-12, %v727_v22 }
 0x4dd   : > { %1953 = vrsqrt.f32 %v733_v23 }
 0x4e3   : > { %v1950_v25 = vpop.eup %1949 }
 0x4e4   : > { %v740_v27 = vmul.f32 %v1950_v25, %v712_v6  ;;  %v1952_v28 = vpop.eup %1951 }
 0x4e5   : > { %v742_v32 = vmul.f32 %v1952_v28, %v714_v7 }
 0x4e6   : > { %v1756_v29 = vpack.c.bf16 %v740_v27, %v739_v26 }
 0x4e7   : > { %v1954_v30 = vpop.eup %1953 }
 0x4e8   : > { %1758 = vmatprep.subr.msk.bf16.mxu1 %vm1757_vm8, %v1756_v29  ;;  %v741_v31 = vmul.f32 %v1954_v30, %v713_v12 }
 0x4e9   : > { %1761 = vmatpush3.bf16.xpose.msk.msra.mxu1 %vm1757_vm8, %v1756_v29 }
 0x4ea   : > { %v1762_v33 = vpack.c.bf16 %v742_v32, %v741_v31 }
 0x4ec   : > { %1764 = vmatprep.subr.msk.bf16.mxu1 %vm1757_vm8, %v1762_v33 }
 0x4f1   : > { %1767 = vmatpush3.bf16.xpose.msk.msra.mxu1 %vm1757_vm8, %v1762_v33 }
 0x4f8   : > { %1705 = vmatmul.mubr.msk.f32.vlgmr.msra.gmra.mrb[0].mxu1 %vm667_vm7, %v744_v34 }
 0x4f9   : > { %1707 = vmatprep.mubr.msk.f32.mxu1 %vm667_vm7, %v745_v35 }
 0x4fc   : > { %1708 = vmatmul.mubr.msk.f32.gmra.mrb[2].mxu1 %vm667_vm7, %v746_v36 }
 0x5cb   : > { %v1706_v37 = vpop.f32.mrb[0].mxu1 }
 0x5cc   : > { %v837_v38 = vpop.f32.mrb[1].mxu1  ;;  %v863_v39 = vsel %vm590_vm5, %v1706_v37, -inf }
 0x5cd   : > { %864 = vmax.xlane.f32.xlu1 %v863_v39  ;;  %v860_v40 = vsel %vm590_vm5, %v837_v38, -inf  ;;  %v920_v39 = vld [vmem:[#allocation6] sm:$0xff] }
 0x5ce   : > { %861 = vmax.xlane.f32.xlu0 %v860_v40 }
 0x5cf   : > { %v2721_v41 = vpop.f32.mrb[2].mxu1 }
 0x5d0   : > { %v2723_v42 = vpop.f32.mrb[3].mxu1  ;;  %v869_v43 = vsel %vm590_vm5, %v2721_v41, -inf }
 0x5d1   : > { %870 = vmax.xlane.f32.xlu1 %v869_v43  ;;  %v866_v44 = vsel %vm590_vm5, %v2723_v42, -inf }
 0x5d2   : > { %867 = vmax.xlane.f32.xlu0 %v866_v44 }
 0x65a   : > { %v865_v48 = vpop.xlane.xlu1 %864 }
 0x65b   : > { %v873_v49 = vmax.f32 %v857_v46, %v865_v48  ;;  %v862_v50 = vpop.xlane.xlu0 %861 }
 0x65c   : > { %v872_v51 = vmax.f32 %v856_v47, %v862_v50 }
 0x65d   : > { %1087 = vst.msk [vmem:[#allocation5 + $0x8] sm:$0xff] %vm944_vm9, %v873_v49  ;;  %895 = vperm.xlu1 %1946, %v873_v49   ;;  %v877_v62 = vsub.f32 %v857_v46, %v873_v49  ;;  %v923_v46 = vld [vmem:[#allocation6 + $0x18] sm:$0xff]  ;;  %v922_v49 = vld [vmem:[#allocation6 + $0x10] sm:$0xff] }
 0x65e   : > { %v876_v54 = vsub.f32 %v856_v47, %v872_v51  ;;  %1086 = vst.msk [vmem:[#allocation5] sm:$0xff] %vm944_vm9, %v872_v51  ;;  %890 = vperm.xlu0 %1945, %v872_v51   ;;  %v871_v55 = vpop.xlane.xlu1 %870 }
 0x65f   : > { %v2736_v56 = vmax.f32 %v2729_v52, %v871_v55  ;;  %v868_v57 = vpop.xlane.xlu0 %867  ;;  %v882_v0 = vmul.f32 1.442695, %v877_v62  ;;  %v949_v55 = vld [vmem:[#allocation7] sm:$0xff] }
 0x660   : > { %v880_v58 = vmul.f32 1.442695, %v876_v54  ;;  %v2739_v59 = vmax.f32 %v2732_v53, %v868_v57  ;;  %v950_v54 = vld [vmem:[#allocation7 + $0x8] sm:$0xff] }
 0x661   : > { %671 = vrot.lane.b32.xlu1 %v2699_v63, %s2282_s4  ;;  %v879_v60 = vsub.f32 %v2729_v52, %v2736_v56  ;;  %1089 = vst.msk [vmem:[#allocation5 + $0x18] sm:$0xff] %vm944_vm9, %v2736_v56 }
 0x662   : > { %1955 = vpow2.f32 %v880_v58  ;;  %v878_v61 = vsub.f32 %v2732_v53, %v2739_v59  ;;  %1088 = vst.msk [vmem:[#allocation5 + $0x10] sm:$0xff] %vm944_vm9, %v2739_v59  ;;  %v952_v58 = vld [vmem:[#allocation7 + $0x18] sm:$0xff] }
 0x663   : > { %1957 = vpow2.f32 %v882_v0  ;;  %v886_v33 = vmul.f32 1.442695, %v879_v60 }
 0x664   : > { %v884_v28 = vmul.f32 1.442695, %v878_v61  ;;  %v951_v61 = vld [vmem:[#allocation7 + $0x10] sm:$0xff] }
 0x665   : > { %683 = vrot.lane.b32.xlu1 %v2699_v63, %s2283_s16 }
 0x669   : > { %905 = vperm.xlu1 %1946, %v2736_v56  }
 0x66c   : > { %v2752_v1 = vpop.eup %1955 }
 0x66d   : > { %955 = vperm.xlu0 %1945, %v2752_v1   ;;  %900 = vperm.xlu1 %1946, %v2739_v59   ;;  %v2758_v2 = vpop.eup %1957 }
 0x671   : > { %695 = vrot.lane.b32.xlu1 %v2699_v63, %s2284_s27 }
 0x675   : > { %707 = vrot.lane.b32.xlu1 %v2699_v63, %s2285_s12 }
 0x679   : > { %960 = vperm.xlu1 %1946, %v2758_v2  }
 0x6dc   : > { %v896_v3 = vpop.permute.xlu1 %895 }
 0x6dd   : > { %v909_v4 = vsub.f32 %v1706_v37, %v896_v3  ;;  %v891_v5 = vpop.permute.xlu0 %890  ;;  %v921_v37 = vld [vmem:[#allocation6 + $0x8] sm:$0xff] }
 0x6de   : > { %v908_v6 = vsub.f32 %v837_v38, %v891_v5  ;;  %v925_v40 = vmul.f32 %v2758_v2, %v921_v37 }
 0x6df   : > { %v914_v7 = vmul.f32 1.442695, %v909_v4 }
 0x6e0   : > { %v912_v8 = vmul.f32 1.442695, %v908_v6  ;;  %v672_v9 = vpop.permute.xlu1 %671 }
 0x6e1   : > { %1959 = vpow2.f32 %v914_v7  ;;  %674 = vst.msk [vmem:[#allocation4] sm:$0xff] %vm667_vm7, %v672_v9 }
 0x6e2   : > { %1961 = vpow2.f32 %v912_v8 }
 0x6e4   : > { %v684_v10 = vpop.permute.xlu1 %683 }
 0x6e5   : > { %686 = vst.msk [vmem:[#allocation4 + $0x8] sm:$0xff] %vm667_vm7, %v684_v10 }
 0x6e8   : > { %v906_v11 = vpop.permute.xlu1 %905  ;;  %v977_v20 = vld [vmem:[#allocation4] sm:$0xff] }
 0x6e9   : > { %v911_v63 = vsub.f32 %v2721_v41, %v906_v11 }
 0x6eb   : > { %v1960_v12 = vpop.eup %1959  ;;  %v918_v13 = vmul.f32 1.442695, %v911_v63  ;;  %v2286_v63 = vmov (!%p1630_p1), 0  }
 0x6ec   : > { %v1962_v14 = vpop.eup %1961  ;;  %v901_v15 = vpop.permute.xlu1 %900  ;;  %v931_v16 = vsel %vm590_vm5, %v1960_v12, 0.0  ;;  %v978_v17 = vld [vmem:[#allocation4 + $0x8] sm:$0xff] }
 0x6ed   : > { %1963 = vpow2.f32 %v918_v13  ;;  %v910_v18 = vsub.f32 %v2723_v42, %v901_v15  ;;  %932 = vadd.xlane.f32.xlu0 %v931_v16  ;;  %1718 = vmatprep.mubr.msk.f32.mxu0 %vm590_vm5, %v1962_v14  ;;  %v928_v19 = vsel %vm590_vm5, %v1962_v14, 0.0  ;;  %v1768_v21 = vpack.c.bf16 %v978_v17, %v977_v20  ;;  %v956_v36 = vpop.permute.xlu0 %955  ;;  %v1141_v17 = vld [vmem:[#allocation18 + $0x8] sm:$0xff] (!%p1630_p1) }
 0x6ee   : > { %929 = vadd.xlane.f32.xlu1 %v928_v19  ;;  %v924_v42 = vmul.f32 %v2752_v1, %v920_v39  ;;  %v973_v57 = vmul.f32 %v956_v36, %v949_v55  ;;  %v1139_v19 = vld [vmem:[#allocation18] sm:$0xff] (!%p1630_p1)  ;;  %v1289_v36 = vld [vmem:[#allocation18 + $0x10] sm:$0xff] (!%p1630_p1)  ;;  %v1365_v39 = vld [vmem:[#allocation18 + $0x18] sm:$0xff] (!%p1630_p1) }
 0x6ef   : > { %v916_v22 = vmul.f32 1.442695, %v910_v18  ;;  %1769 = vmatprep.subr.bf16.mxu0 %v1768_v21  ;;  %v2287_v18 = vmov (!%p1630_p1), 0.0  }
 0x6f0   : > { %v696_v23 = vpop.permute.xlu1 %695  ;;  %1771 = vmatpush3.bf16.msra.mxu0 %v1768_v21  ;;  %1729 = vmatprep.subr.mxu1 (!%p1630_p1), %v2287_v18 }
 0x6f1   : > { %1965 = vpow2.f32 %v916_v22  ;;  %698 = vst.msk [vmem:[#allocation4 + $0x10] sm:$0xff] %vm667_vm7, %v696_v23  ;;  %1731 = vmatprep.mubr.msk.f32.mxu1 (!%p1630_p1), %vm2288_vm10, %v2287_v18  ;;  %1730 = vmatpush3.msra.mxu1 (!%p1630_p1), %v1139_v19 }
 0x6f2   : > { %1967 = vpow2.f32 %v884_v28  ;;  %1739 = vmatprep.subr.mxu1 (!%p1630_p1), %v2287_v18 }
 0x6f3   : > { %1969 = vpow2.f32 %v886_v33 }
 0x6f4   : > { %v708_v24 = vpop.permute.xlu1 %707 }
 0x6f5   : > { %710 = vst.msk [vmem:[#allocation4 + $0x18] sm:$0xff] %vm667_vm7, %v708_v24 }
 0x6f7   : > { %v1964_v25 = vpop.eup %1963 }
 0x6f8   : > { %v937_v26 = vsel %vm590_vm5, %v1964_v25, 0.0  ;;  %v979_v30 = vld [vmem:[#allocation4 + $0x10] sm:$0xff]  ;;  %v961_v38 = vpop.permute.xlu1 %960 }
 0x6f9   : > { %938 = vadd.xlane.f32.xlu1 %v937_v26  ;;  %v974_v56 = vmul.f32 %v961_v38, %v950_v54 }
 0x6fb   : > { %v1966_v27 = vpop.eup %1965 }
 0x6fc   : > { %v934_v29 = vsel %vm590_vm5, %v1966_v27, 0.0  ;;  %v980_v31 = vld [vmem:[#allocation4 + $0x18] sm:$0xff]  ;;  %v1968_v34 = vpop.eup %1967 }
 0x6fd   : > { %935 = vadd.xlane.f32.xlu0 %v934_v29  ;;  %v1772_v32 = vpack.c.bf16 %v980_v31, %v979_v30  ;;  %v1970_v35 = vpop.eup %1969  ;;  %v926_v51 = vmul.f32 %v1968_v34, %v922_v49 }
 0x6fe   : > { %v927_v47 = vmul.f32 %v1970_v35, %v923_v46 }
 0x6ff   : > { %1773 = vmatprep.subr.bf16.mxu0 %v1772_v32 }
 0x700   : > { %1775 = vmatpush3.bf16.msra.mxu0 %v1772_v32 }
 0x701   : > { %1724 = vmatprep.subr.mxu0 (!%p1630_p1), %v2287_v18 }
 0x703   : > { %1719 = vmatmul.mubr.msk.f32.vlgmr.msra.gmra.mrb[2].mxu0 %vm590_vm5, %v1960_v12 }
 0x704   : > { %1721 = vmatprep.mubr.msk.f32.mxu0 %vm590_vm5, %v1966_v27  ;;  %1725 = vmatpush3.msra.mxu0 (!%p1630_p1), %v1141_v17 }
 0x705   : > { %1734 = vmatprep.subr.mxu0 (!%p1630_p1), %v2287_v18 }
 0x707   : > { %1722 = vmatmul.mubr.msk.f32.gmra.mrb[4].mxu0 %vm590_vm5, %v1964_v25 }
 0x708   : > { %1726 = vmatprep.mubr.msk.f32.mxu0 (!%p1630_p1), %vm2288_vm10, %v2287_v18 }
 0x70a   : > { %965 = vperm.xlu1 %1946, %v1968_v34  }
 0x70e   : > { %1972 = vset.pattern.permute.xlu1 (!%p1630_p1), %v2286_v63 }
 0x713   : > { %970 = vperm.xlu0 %1945, %v1970_v35  }
 0x717   : > { %1971 = vset.pattern.permute.xlu0 (!%p1630_p1), %v2286_v63 }
 0x77a   : > { %v933_v41 = vpop.xlane.xlu0 %932 }
 0x77b   : > { %v941_v43 = vadd.f32 %v933_v41, %v925_v40  ;;  %v930_v44 = vpop.xlane.xlu1 %929 }
 0x77c   : > { %v940_v45 = vadd.f32 %v930_v44, %v924_v42 }
 0x77d   : > { %946 = vst.msk [vmem:[#allocation6 + $0x8] sm:$0xff] %vm944_vm9, %v941_v43 }
 0x77e   : > { %945 = vst.msk [vmem:[#allocation6] sm:$0xff] %vm944_vm9, %v940_v45 }
 0x784   : > { %v1099_v10 = vld [vmem:[#allocation6 + $0x8] sm:$0xff] (!%p1630_p1) }
 0x785   : > { %v1098_v12 = vld [vmem:[#allocation6] sm:$0xff] (!%p1630_p1) }
 0x786   : > { %v939_v48 = vpop.xlane.xlu1 %938 }
 0x787   : > { %v943_v50 = vadd.f32 %v939_v48, %v927_v47 }
 0x789   : > { %948 = vst.msk [vmem:[#allocation6 + $0x18] sm:$0xff] %vm944_vm9, %v943_v50 }
 0x78a   : > { %v936_v52 = vpop.xlane.xlu0 %935  ;;  %v966_v62 = vpop.permute.xlu1 %965 }
 0x78b   : > { %v942_v53 = vadd.f32 %v936_v52, %v926_v51  ;;  %v975_v4 = vmul.f32 %v966_v62, %v951_v61  ;;  %v1635_v51 = vld [vmem:[%s2923_s18] ss:$0 sm:$0xff] (!%p1630_p1) }
 0x78d   : > { %947 = vst.msk [vmem:[#allocation6 + $0x10] sm:$0xff] %vm944_vm9, %v942_v53 }
 0x790   : > { %v1101_v11 = vld [vmem:[#allocation6 + $0x18] sm:$0xff] (!%p1630_p1) }
 0x792   : > { %v971_v59 = vpop.permute.xlu0 %970 }
 0x793   : > { %v976_v3 = vmul.f32 %v971_v59, %v952_v58 }
 0x794   : > { %v1100_v9 = vld [vmem:[#allocation6 + $0x10] sm:$0xff] (!%p1630_p1) }
 0x795   : > { %1973 = vrcp.f32 (!%p1630_p1), %v1100_v9 }
 0x796   : > { %1975 = vrcp.f32 (!%p1630_p1), %v1099_v10 }
 0x797   : > { %1977 = vrcp.f32 (!%p1630_p1), %v1101_v11 }
 0x798   : > { %1979 = vrcp.f32 (!%p1630_p1), %v1098_v12 }
 0x79f   : > { %v1974_v13 = vpop.eup (!%p1630_p1), %1973 }
 0x7a0   : > { %v1976_v14 = vpop.eup (!%p1630_p1), %1975  ;;  %1118 = vperm.xlu1 (!%p1630_p1), %1972, %v1974_v13  }
 0x7a1   : > { %v1978_v15 = vpop.eup (!%p1630_p1), %1977  ;;  %1113 = vperm.xlu0 (!%p1630_p1), %1971, %v1976_v14  }
 0x7a2   : > { %v1980_v16 = vpop.eup (!%p1630_p1), %1979 }
 0x7a4   : > { %1123 = vperm.xlu1 (!%p1630_p1), %1972, %v1978_v15  }
 0x7a5   : > { %1108 = vperm.xlu0 (!%p1630_p1), %1971, %v1980_v16  }
 0x7d6   : > { %v1720_v60 = vpop.f32.mrb[2].mxu0 }
 0x7d7   : > { %v1079_v0 = vadd.f32 %v1720_v60, %v974_v56  ;;  %v1059_v1 = vpop.f32.mrb[3].mxu0 }
 0x7d8   : > { %v1078_v2 = vadd.f32 %v1059_v1, %v973_v57  ;;  %1093 = sbr.rel (%p1630_p1) target bundleno = 2318 (0x90e), region = 80 }
 0x7d9   : > { %1083 = vst.msk [vmem:[#allocation7 + $0x8] sm:$0xff] %vm667_vm7, %v1079_v0 }
 0x7da   : > { %1082 = vst.msk [vmem:[#allocation7] sm:$0xff] %vm667_vm7, %v1078_v2  ;;  %v1723_v5 = vpop.f32.mrb[4].mxu0 }
 0x7db   : > { %v1081_v6 = vadd.f32 %v1723_v5, %v976_v3  ;;  %v1069_v7 = vpop.f32.mrb[5].mxu0 }
 0x7dc   : > { %v1080_v8 = vadd.f32 %v1069_v7, %v975_v4 }
 0x7dd   : > { %1085 = vst.msk [vmem:[#allocation7 + $0x18] sm:$0xff] %vm667_vm7, %v1081_v6 }
 0x7de   : > { %1084 = vst.msk [vmem:[#allocation7 + $0x10] sm:$0xff] %vm667_vm7, %v1080_v8 }
 0x7e0   : > { %v1095_v21 = vld [vmem:[#allocation7 + $0x8] sm:$0xff] }
 0x7e1   : > { %v1094_v28 = vld [vmem:[#allocation7] sm:$0xff] }
 0x7e4   : > { %v1097_v26 = vld [vmem:[#allocation7 + $0x18] sm:$0xff] }
 0x7e5   : > { %v1096_v20 = vld [vmem:[#allocation7 + $0x10] sm:$0xff] }
 0x81f   : > { %v1119_v22 = vpop.permute.xlu1 %1118 }
 0x820   : > { %v1128_v23 = vmul.f32 %v1119_v22, %v1096_v20  ;;  %v1114_v24 = vpop.permute.xlu0 %1113 }
 0x821   : > { %v1127_v25 = vmul.f32 %v1114_v24, %v1095_v21 }
 0x822   : > { %v1132_v27 = vmul.f32 %v1128_v23, %v1128_v23 }
 0x823   : > { %v1131_v29 = vmul.f32 %v1127_v25, %v1127_v25  ;;  %v1124_v30 = vpop.permute.xlu1 %1123 }
 0x824   : > { %1136 = vst.msk [vmem:[#allocation7 + $0x10] sm:$0xff] %vm667_vm7, %v1132_v27  ;;  %v1129_v31 = vmul.f32 %v1124_v30, %v1097_v26  ;;  %v1109_v32 = vpop.permute.xlu0 %1108 }
 0x825   : > { %1135 = vst.msk [vmem:[#allocation7 + $0x8] sm:$0xff] %vm667_vm7, %v1131_v29  ;;  %v1126_v33 = vmul.f32 %v1109_v32, %v1094_v28 }
 0x826   : > { %v1133_v34 = vmul.f32 %v1129_v31, %v1129_v31 }
 0x827   : > { %v1130_v35 = vmul.f32 %v1126_v33, %v1126_v33 }
 0x828   : > { %1137 = vst.msk [vmem:[#allocation7 + $0x18] sm:$0xff] %vm667_vm7, %v1133_v34 }
 0x829   : > { %1134 = vst.msk [vmem:[#allocation7] sm:$0xff] %vm667_vm7, %v1130_v35 }
 0x82b   : > { %v1288_v38 = vld [vmem:[#allocation7 + $0x10] sm:$0xff] }
 0x82c   : > { %v1140_v37 = vld [vmem:[#allocation7 + $0x8] sm:$0xff] }
 0x82d   : > { %1727 = vmatmul.mubr.msk.f32.vlgmr.msra.gmra.mrb[0].mxu0 %vm667_vm7, %v1140_v37 }
 0x82e   : > { %1735 = vmatpush3.msra.mxu0 %v1289_v36  ;;  %1736 = vmatprep.mubr.msk.f32.mxu0 %vm2288_vm10, %v2287_v18 }
 0x82f   : > { %v1364_v41 = vld [vmem:[#allocation7 + $0x18] sm:$0xff] }
 0x830   : > { %v1138_v40 = vld [vmem:[#allocation7] sm:$0xff] }
 0x831   : > { %1732 = vmatmul.mubr.msk.f32.vlgmr.msra.gmra.mrb[0].mxu1 %vm667_vm7, %v1138_v40  ;;  %1737 = vmatmul.mubr.msk.f32.vlgmr.msra.gmra.mrb[2].mxu0 %vm667_vm7, %v1288_v38 }
 0x832   : > { %1740 = vmatpush3.msra.mxu1 %v1365_v39  ;;  %1741 = vmatprep.mubr.msk.f32.mxu1 %vm2288_vm10, %v2287_v18 }
 0x835   : > { %1742 = vmatmul.mubr.msk.f32.vlgmr.msra.gmra.mrb[2].mxu1 %vm667_vm7, %v1364_v41 }
 0x900   : > { %v1211_v42 = vpop.f32.mrb[0].mxu0 }
 0x901   : > { %v1728_v43 = vpop.f32.mrb[1].mxu0 }
 0x904   : > { %v1284_v44 = vpop.f32.mrb[0].mxu1  ;;  %v1359_v45 = vpop.f32.mrb[2].mxu0 }
 0x905   : > { %v1285_v46 = vadd.f32 %v1284_v44, %v1211_v42  ;;  %v1733_v47 = vpop.f32.mrb[1].mxu1  ;;  %v1738_v48 = vpop.f32.mrb[3].mxu0 }
 0x907   : > { %v1363_v49 = vadd.f32 %v1359_v45, %v1285_v46 }
 0x908   : > { %v1435_v50 = vpop.f32.mrb[2].mxu1 }
 0x909   : > { %v1439_v52 = vadd.f32 %v1435_v50, %v1363_v49  ;;  %v1743_v53 = vpop.f32.mrb[3].mxu1 }
 0x90b   : > { %v1447_v54 = vadd.f32 %v1635_v51, %v1439_v52 }
 0x90d   : > { %1448 = vst.msk [vmem:[%s2670_s11] sm:$0xff] %vm590_vm5, %v1447_v54 }
 0x90e PF: > { %s2924_s2 = sld [smem:[#allocation26_spill]]  ;;  %s2925_s8 = sld [smem:[#allocation34_spill]] }
 0x90f   : > { %s1463_s16 = sshll.u32 %s2670_s11, 4  ;;  %s1450_s27 = scalar_lea.sflag [#allocation12], %s2643_s23  ;;  %s1464_s16 = int_to_ptr.vmem [resolvable:$true] %s1463_s16 }
 0x910   : > { %s2125_s12 = scalar_lea.vmem %s1464_s16, 128  ;;  %p2926_p13 = scmp.ne.s32.totalorder %s2902_s17, 0 }
 0x911   : > { %p2126_p11 = scmp.ne.s32.totalorder %s1464_s16, %s2125_s12  ;;  %s2289_s0 = smov [#allocation19]  }
 0x912   : > { %s2129_s25 = sshll.u32 %s2289_s0, 4  ;;  %s2130_s25 = int_to_ptr.vmem [resolvable:$false] %s2129_s25 }
 0x913   : > { %p2127_p4 = pnand %p2126_p11, %p2926_p13  ;;  %s2131_s26 = scalar_lea.vmem %s2130_s25, 256 }
 0x914   : > { %s1637_s22 = sshll.u32 %s2924_s2, 7  ;;  %p2132_p10 = scmp.lt.s32.totalorder %s1464_s16, %s2130_s25 }
 0x915   : > { %s2810_s4 = scalar_lea.hbm %s2925_s8, %s1637_s22  ;;  %p2128_p6 = pneg %p2127_p4 }
 0x916   : > { %p2133_p8 = scmp.lt.s32.totalorder %s2131_s26, %s2125_s12 }
 0x918   : > { %p2134_p5 = por %p2133_p8, %p2132_p10 }
 0x91a   : > { %p2135_p9 = pnand %p2134_p5, %p2128_p6 }
 0x91c   : > { %2138 = shalt.err (!%p2135_p9)
}
 0x91d   : > { %s2139_s23 = scalar_lea.hbm %s2810_s4, 128  ;;  %s2143_s2 = scalar_lea.hbm %s2925_s8, 256 }
 0x91e   : > { %p2140_p12 = scmp.ne.s32.totalorder %s2810_s4, %s2139_s23  ;;  %p2144_p7 = scmp.lt.u32.totalorder %s2810_s4, %s2925_s8 }
 0x91f   : > { %p2145_p0 = scmp.lt.u32.totalorder %s2143_s2, %s2139_s23  ;;  %p2147_p11 = scmp.lt.u32.totalorder %s2139_s23, %s2810_s4 }
 0x920   : > { %p2141_p2 = pnand %p2140_p12, %p2926_p13 }
 0x921   : > { %p2146_p1 = por %p2145_p0, %p2144_p7 }
 0x922   : > { %p2142_p3 = pneg %p2141_p2 }
 0x923   : > { %p2148_p4 = por %p2147_p11, %p2146_p1 }
 0x925   : > { %p2149_p6 = pnand %p2148_p4, %p2142_p3 }
 0x927   : > { %2152 = shalt.err (!%p2149_p6)
}
 0x928   : > { %1792 = dma.vmem_to_hbm [thread:$0]  (%p2926_p13), %s1464_s16, 128, %s2810_s4, %s1450_s27  }
 0x929 PF: > { %p1822_p10 = scmp.ge.s32.totalorder %s2259_s15, 2  ;;  %s1475_s3 = sand.u32 1, %s2231_s30  }
 0x92a   : > { %p2927_p8 = scmp.ne.s32.totalorder %s2903_s24, 0  ;;  %s1476_s12 = scalar_lea.sflag [#allocation12], %s1475_s3 }
 0x92c   : > { %p1812_p5 = pnand %p1822_p10, %p2927_p8 }
 0x92e   : > { %2214 = dma.done.wait (!%p1812_p5), %s1476_s12, 128  }
 0x92f   : > { %2216 = vsyncadd (!%p1812_p5), %s1476_s12, 4294967168  ;;  %s28_s15 = sadd.s32 1, %s2259_s15   ;;  %s2928_s27 = smov %s2223_s28 }
 0x930   : > { %p25_p9 = scmp.ge.s32.totalorder %s28_s15, 6   ;;  %s2929_s28 = smov %s2227_s29 }
 0x931   : > { %s2930_s29 = smov %s2589_s19  ;;  %s2931_s30 = smov %s2235_s9 }
 0x932   : > { %s2932_s9 = smov %s2239_s10  ;;  %s2933_s10 = smov %s2598_s21 }
 0x933   : > { %s2934_s11 = smov %s2251_s13  ;;  %s2935_s12 = smov %s2255_s14 }
 0x934   : > { %s2936_s13 = smov %s2939_s7  ;;  %s2937_s14 = smov %s2943_s20 }
 0x935   :  { %27 = sbr.rel (!%p25_p9) target bundleno = 20 (0x14), region = 130 }
 0x93c   :  { %1481 = vsyncpa [#allocation11], 1 }
 0x93d   :  { %1483 = vsyncpa [#allocation11 + $0x1], 1 }
 0x93e   :  { %1484 = vsyncpa [#allocation14], 1 }
 0x93f   :  { %1486 = vsyncpa [#allocation14 + $0x1], 1 }
 0x940   :  { %1487 = vsyncpa [#allocation17], 1 }
 0x941   :  { %1488 = vsyncpa [#allocation12], 1 }
 0x942   :  { %1490 = vsyncpa [#allocation12 + $0x1], 1 }

</bundles_post_ra>
